<compile_context>
chip_gen: v7x
topology: tpu7x:2x2x1
jax: 0.10.0
libtpu: 0.0.40
codegen_flags: <defaults>
</compile_context>

<pallas_src>
import jax
import jax.numpy as jnp
from jax.experimental import pallas as pl
from jax.experimental.pallas import tpu as pltpu


def _round_up(n, m):
    return (n + m - 1) // m * m


def _choose_batch_tiling(B, requested_tile):
    """Pick (tile_b, padded_B). Prefers no-padding tilings; keeps grid >= ~8
    steps for large batches so both v7x TensorCores get a real pipeline."""
    padded = _round_up(B, 16)                      # bf16 sublane packing
    tile = max(16, requested_tile - requested_tile % 16)
    if padded >= 8 * 256:                          # big batch: keep >= ~8 steps
        tile = min(tile, _round_up(padded // 8, 16))
    tile = min(tile, padded)
    # Prefer a tile that divides the 16-aligned batch exactly: no jnp.pad and
    # no extra HBM pass over x / eps in the wrapper.
    t = tile
    while padded % t:
        t -= 16
    if t >= min(256, padded):
        return t, padded
    # Ragged batch with no decent divisor: fall back to padding.
    return tile, _round_up(padded, tile)


def vae_kernel(
    x_ref, eps_ref,
    w1_ref, b1_ref,
    w2_ref, b2_ref,
    w3_ref, b3_ref,
    w4_ref, b4_ref,
    out_ref,
):
    latent_dim = eps_ref.shape[-1]

    # Matmuls: bf16 operands, f32 MXU accumulation. All elementwise math in
    # f32 (v5e has no bf16 VPU/EUP). Biases are f32 and added after the dot.

    # ---- encoder: Linear -> ReLU -> Linear (fused mean|log_var projection) ----
    h = jnp.dot(x_ref[...], w1_ref[...],
                preferred_element_type=jnp.float32) + b1_ref[...]
    h = jnp.maximum(h, 0.0)

    stats = jnp.dot(h.astype(w2_ref.dtype), w2_ref[...],
                    preferred_element_type=jnp.float32) + b2_ref[...]
    mean = stats[:, :latent_dim]        # torch.chunk(h, 2, dim=-1)[0]
    log_var = stats[:, latent_dim:]     # torch.chunk(h, 2, dim=-1)[1]

    # ---- reparameterize: z = mean + eps * exp(0.5 * log_var) ----
    z = mean + eps_ref[...].astype(jnp.float32) * jnp.exp(0.5 * log_var)

    # ---- decoder: Linear -> ReLU -> Linear -> Softmax(dim=-1) ----
    h2 = jnp.dot(z.astype(w3_ref.dtype), w3_ref[...],
                 preferred_element_type=jnp.float32) + b3_ref[...]
    h2 = jnp.maximum(h2, 0.0)

    logits = jnp.dot(h2.astype(w4_ref.dtype), w4_ref[...],
                     preferred_element_type=jnp.float32) + b4_ref[...]
    m = jnp.max(logits, axis=-1, keepdims=True)
    e = jnp.exp(logits - m)
    recon = e / jnp.sum(e, axis=-1, keepdims=True)   # exact normalization

    # Single packed, wider-lane store: [recon | mean | log_var].
    out_ref[...] = jnp.concatenate([recon, stats], axis=-1).astype(out_ref.dtype)


def vae_forward(x, eps, params, *, tile_b=1024):
    """Full VAEPd forward as one batch-tiled Pallas kernel.

    Returns (recon [B, input_dim], mean [B, latent], log_var [B, latent]) in f32.
    """
    B, input_dim = x.shape
    latent_dim = eps.shape[-1]
    hidden_dim = params["w1"].shape[-1]
    out_cols = input_dim + 2 * latent_dim

    tile_b, padded_B = _choose_batch_tiling(B, tile_b)

    # bf16 HBM I/O for the activation streams; weights bf16 (tiny + resident),
    # biases stay f32 (added after the f32-accumulated matmul).
    x_in = x.astype(jnp.bfloat16)
    eps_in = eps.astype(jnp.bfloat16)
    if padded_B != B:
        # TODO(synk): handle the ragged tail with a masked last block instead
        # of materializing a padded copy (extra HBM pass) when B is unaligned.
        pad = padded_B - B
        x_in = jnp.pad(x_in, ((0, pad), (0, 0)))
        eps_in = jnp.pad(eps_in, ((0, pad), (0, 0)))

    w = {k: (v.astype(jnp.bfloat16) if k.startswith("w") else v.astype(jnp.float32))
         for k, v in params.items()}

    grid = (padded_B // tile_b,)

    def row_spec(cols):          # tiled along the batch axis
        return pl.BlockSpec((tile_b, cols), lambda i: (i, 0))

    def const_spec(shape):       # same block every step -> stays resident in VMEM
        return pl.BlockSpec(shape, lambda i: (0,) * len(shape))

    # VMEM budget from actual buffer math: double-buffered bf16 I/O blocks +
    # (double-buffered) weights/biases + headroom; clamped under v7x's 64 MiB.
    w_bytes = sum(int(v.size) * v.dtype.itemsize for v in w.values())
    io_bytes = 2 * tile_b * (input_dim + latent_dim + out_cols) * 2  # bf16, 2-deep
    vmem_limit = int(min(max(2 * (io_bytes + 2 * w_bytes) + (4 << 20), 16 << 20),
                         48 << 20))

    flops = 2 * padded_B * (input_dim * hidden_dim + hidden_dim * 2 * latent_dim
                            + latent_dim * hidden_dim + hidden_dim * input_dim)
    bytes_accessed = (padded_B * (input_dim + latent_dim + out_cols) * 2  # bf16 I/O
                      + w_bytes)
    cost = pl.CostEstimate(
        flops=flops,
        transcendentals=padded_B * (latent_dim + input_dim),  # reparam exp + softmax exp
        bytes_accessed=bytes_accessed,
    )

    out = pl.pallas_call(
        vae_kernel,
        out_shape=jax.ShapeDtypeStruct((padded_B, out_cols), jnp.bfloat16),
        grid=grid,
        in_specs=[
            row_spec(input_dim),                 # x
            row_spec(latent_dim),                # eps
            const_spec(w["w1"].shape), const_spec(w["b1"].shape),
            const_spec(w["w2"].shape), const_spec(w["b2"].shape),  # fused mean|log_var
            const_spec(w["w3"].shape), const_spec(w["b3"].shape),
            const_spec(w["w4"].shape), const_spec(w["b4"].shape),
        ],
        out_specs=row_spec(out_cols),
        compiler_params=pltpu.CompilerParams(
            dimension_semantics=("parallel",),   # v7x megacore; ~neutral on v5e/v6e
            vmem_limit_bytes=vmem_limit,
        ),
        cost_estimate=cost,
    )(
        x_in, eps_in,
        w["w1"], w["b1"],
        w["w2"], w["b2"],
        w["w3"], w["b3"],
        w["w4"], w["b4"],
    )

    out = out[:B].astype(jnp.float32)
    recon = out[:, :input_dim]
    mean = out[:, input_dim:input_dim + latent_dim]
    log_var = out[:, input_dim + latent_dim:]
    return recon, mean, log_var


def init_params(key, input_dim, hidden_dim, latent_dim):
    """Deterministic synthetic params. Weights are [in, out]; biases [1, out]."""
    ks = jax.random.split(key, 8)

    def lin(kw, kb, fan_in, fan_out):
        bound = 1.0 / jnp.sqrt(fan_in)
        w_ = jax.random.uniform(kw, (fan_in, fan_out), jnp.float32, -bound, bound)
        b_ = jax.random.uniform(kb, (1, fan_out), jnp.float32, -bound, bound)
        return w_, b_

    w1, b1 = lin(ks[0], ks[1], input_dim, hidden_dim)
    w2, b2 = lin(ks[2], ks[3], hidden_dim, 2 * latent_dim)  # fused mean|log_var
    w3, b3 = lin(ks[4], ks[5], latent_dim, hidden_dim)
    w4, b4 = lin(ks[6], ks[7], hidden_dim, input_dim)

    return {"w1": w1, "b1": b1, "w2": w2, "b2": b2,
            "w3": w3, "b3": b3, "w4": w4, "b4": b4}


def vae_reference(x, eps, p):
    """Plain-JAX f32 reference on the same bf16-quantized operands the kernel sees."""
    bf = lambda a: a.astype(jnp.bfloat16).astype(jnp.float32)
    latent_dim = eps.shape[-1]
    xq, epsq = bf(x), bf(eps)
    w1, w2, w3, w4 = bf(p["w1"]), bf(p["w2"]), bf(p["w3"]), bf(p["w4"])
    h = jnp.maximum(xq @ w1 + p["b1"], 0.0)
    stats = h @ w2 + p["b2"]
    mean, log_var = stats[:, :latent_dim], stats[:, latent_dim:]
    z = mean + epsq * jnp.exp(0.5 * log_var)
    h2 = jnp.maximum(z @ w3 + p["b3"], 0.0)
    logits = h2 @ w4 + p["b4"]
    recon = jax.nn.softmax(logits, axis=-1)
    return recon, mean, log_var


if __name__ == "__main__":
    # Small-but-representative shapes: 2 batch tiles of 256 rows each.
    B, input_dim, hidden_dim, latent_dim = 512, 32, 64, 16

    key = jax.random.PRNGKey(0)
    k_x, k_eps, k_p = jax.random.split(key, 3)

    x = jax.random.normal(k_x, (B, input_dim), jnp.float32)
    eps = jax.random.normal(k_eps, (B, latent_dim), jnp.float32)  # torch.randn_like
    params = init_params(k_p, input_dim, hidden_dim, latent_dim)

    recon, mean, log_var = vae_forward(x, eps, params, tile_b=256)
    jax.block_until_ready((recon, mean, log_var))

    r_ref, m_ref, lv_ref = vae_reference(x, eps, params)

    assert recon.shape == (B, input_dim)
    assert mean.shape == (B, latent_dim) and log_var.shape == (B, latent_dim)
    # bf16 activation/operand precision + bf16 output slab -> ~1e-2 tolerances.
    assert jnp.allclose(mean, m_ref, atol=2e-2), "mean mismatch"
    assert jnp.allclose(log_var, lv_ref, atol=2e-2), "log_var mismatch"
    assert jnp.allclose(recon, r_ref, atol=1e-2), "recon mismatch"
    assert jnp.allclose(jnp.sum(recon, axis=-1), 1.0, atol=1e-2), "softmax rows != 1"

    print("KERNEL_OK")
</pallas_src>

<mosaic_0001>
module attributes {stable_mosaic.version = 11 : i64} {
  func.func @vae_kernel(%arg0: i32, %arg1: memref<256x32xbf16, #tpu.memory_space<vmem>>, %arg2: memref<256x16xbf16, #tpu.memory_space<vmem>>, %arg3: memref<32x64xbf16, #tpu.memory_space<vmem>>, %arg4: memref<1x64xf32, #tpu.memory_space<vmem>>, %arg5: memref<64x32xbf16, #tpu.memory_space<vmem>>, %arg6: memref<1x32xf32, #tpu.memory_space<vmem>>, %arg7: memref<16x64xbf16, #tpu.memory_space<vmem>>, %arg8: memref<1x64xf32, #tpu.memory_space<vmem>>, %arg9: memref<64x32xbf16, #tpu.memory_space<vmem>>, %arg10: memref<1x32xf32, #tpu.memory_space<vmem>>, %arg11: memref<256x64xbf16, #tpu.memory_space<vmem>>) attributes {dimension_semantics = [#tpu.dimension_semantics<parallel>], iteration_bounds = array<i64: 2>, scalar_prefetch = 0 : i64, scratch_operands = 0 : i64, tpu.core_type = #tpu.core_type<tc>, window_params = [{transform_indices = @transform_0, window_bounds = array<i64: 256, 32>}, {transform_indices = @transform_1, window_bounds = array<i64: 256, 16>}, {pipeline_mode = #tpu.pipeline_mode<synchronous>, transform_indices = @transform_2, window_bounds = array<i64: 32, 64>}, {pipeline_mode = #tpu.pipeline_mode<synchronous>, transform_indices = @transform_3, window_bounds = array<i64: 1, 64>}, {pipeline_mode = #tpu.pipeline_mode<synchronous>, transform_indices = @transform_4, window_bounds = array<i64: 64, 32>}, {pipeline_mode = #tpu.pipeline_mode<synchronous>, transform_indices = @transform_5, window_bounds = array<i64: 1, 32>}, {pipeline_mode = #tpu.pipeline_mode<synchronous>, transform_indices = @transform_6, window_bounds = array<i64: 16, 64>}, {pipeline_mode = #tpu.pipeline_mode<synchronous>, transform_indices = @transform_7, window_bounds = array<i64: 1, 64>}, {pipeline_mode = #tpu.pipeline_mode<synchronous>, transform_indices = @transform_8, window_bounds = array<i64: 64, 32>}, {pipeline_mode = #tpu.pipeline_mode<synchronous>, transform_indices = @transform_9, window_bounds = array<i64: 1, 32>}, {transform_indices = @transform_10, window_bounds = array<i64: 256, 64>}]} {
    %c0 = arith.constant 0 : index
    %c0_0 = arith.constant 0 : index
    %0 = vector.load %arg1[%c0, %c0_0] : memref<256x32xbf16, #tpu.memory_space<vmem>>, vector<256x32xbf16>
    %c0_1 = arith.constant 0 : index
    %c0_2 = arith.constant 0 : index
    %1 = vector.load %arg3[%c0_1, %c0_2] : memref<32x64xbf16, #tpu.memory_space<vmem>>, vector<32x64xbf16>
    %cst = arith.constant dense<0.000000e+00> : vector<256x64xf32>
    %2 = tpu.matmul %0, %1, %cst {dimension_numbers = #tpu.dot_dimension_numbers<[1], [0], [0], [1], [0, 0, 1, 1], [], []>} : vector<256x32xbf16>, vector<32x64xbf16>, vector<256x64xf32> -> vector<256x64xf32>
    %c0_3 = arith.constant 0 : index
    %c0_4 = arith.constant 0 : index
    %3 = vector.load %arg4[%c0_3, %c0_4] : memref<1x64xf32, #tpu.memory_space<vmem>>, vector<1x64xf32>
    %4 = vector.broadcast %3 : vector<1x64xf32> to vector<256x64xf32>
    %5 = arith.addf %2, %4 : vector<256x64xf32>
    %cst_5 = arith.constant 0.000000e+00 : f32
    %6 = vector.broadcast %cst_5 : f32 to vector<256x64xf32>
    %7 = arith.maximumf %5, %6 : vector<256x64xf32>
    %8 = arith.truncf %7 : vector<256x64xf32> to vector<256x64xbf16>
    %c0_6 = arith.constant 0 : index
    %c0_7 = arith.constant 0 : index
    %9 = vector.load %arg5[%c0_6, %c0_7] : memref<64x32xbf16, #tpu.memory_space<vmem>>, vector<64x32xbf16>
    %cst_8 = arith.constant dense<0.000000e+00> : vector<256x32xf32>
    %10 = tpu.matmul %8, %9, %cst_8 {dimension_numbers = #tpu.dot_dimension_numbers<[1], [0], [0], [1], [0, 0, 1, 1], [], []>} : vector<256x64xbf16>, vector<64x32xbf16>, vector<256x32xf32> -> vector<256x32xf32>
    %c0_9 = arith.constant 0 : index
    %c0_10 = arith.constant 0 : index
    %11 = vector.load %arg6[%c0_9, %c0_10] : memref<1x32xf32, #tpu.memory_space<vmem>>, vector<1x32xf32>
    %12 = vector.broadcast %11 : vector<1x32xf32> to vector<256x32xf32>
    %13 = arith.addf %10, %12 : vector<256x32xf32>
    %14 = vector.extract_strided_slice %13 {offsets = [0, 0], sizes = [256, 16], strides = [1, 1]} : vector<256x32xf32> to vector<256x16xf32>
    %15 = vector.extract_strided_slice %13 {offsets = [0, 16], sizes = [256, 16], strides = [1, 1]} : vector<256x32xf32> to vector<256x16xf32>
    %c0_11 = arith.constant 0 : index
    %c0_12 = arith.constant 0 : index
    %16 = vector.load %arg2[%c0_11, %c0_12] : memref<256x16xbf16, #tpu.memory_space<vmem>>, vector<256x16xbf16>
    %17 = arith.extf %16 : vector<256x16xbf16> to vector<256x16xf32>
    %cst_13 = arith.constant 5.000000e-01 : f32
    %18 = vector.broadcast %cst_13 : f32 to vector<256x16xf32>
    %19 = arith.mulf %18, %15 : vector<256x16xf32>
    %20 = math.exp %19 : vector<256x16xf32>
    %21 = arith.mulf %17, %20 : vector<256x16xf32>
    %22 = arith.addf %14, %21 : vector<256x16xf32>
    %23 = arith.truncf %22 : vector<256x16xf32> to vector<256x16xbf16>
    %c0_14 = arith.constant 0 : index
    %c0_15 = arith.constant 0 : index
    %24 = vector.load %arg7[%c0_14, %c0_15] : memref<16x64xbf16, #tpu.memory_space<vmem>>, vector<16x64xbf16>
    %cst_16 = arith.constant dense<0.000000e+00> : vector<256x64xf32>
    %25 = tpu.matmul %23, %24, %cst_16 {dimension_numbers = #tpu.dot_dimension_numbers<[1], [0], [0], [1], [0, 0, 1, 1], [], []>} : vector<256x16xbf16>, vector<16x64xbf16>, vector<256x64xf32> -> vector<256x64xf32>
    %c0_17 = arith.constant 0 : index
    %c0_18 = arith.constant 0 : index
    %26 = vector.load %arg8[%c0_17, %c0_18] : memref<1x64xf32, #tpu.memory_space<vmem>>, vector<1x64xf32>
    %27 = vector.broadcast %26 : vector<1x64xf32> to vector<256x64xf32>
    %28 = arith.addf %25, %27 : vector<256x64xf32>
    %cst_19 = arith.constant 0.000000e+00 : f32
    %29 = vector.broadcast %cst_19 : f32 to vector<256x64xf32>
    %30 = arith.maximumf %28, %29 : vector<256x64xf32>
    %31 = arith.truncf %30 : vector<256x64xf32> to vector<256x64xbf16>
    %c0_20 = arith.constant 0 : index
    %c0_21 = arith.constant 0 : index
    %32 = vector.load %arg9[%c0_20, %c0_21] : memref<64x32xbf16, #tpu.memory_space<vmem>>, vector<64x32xbf16>
    %cst_22 = arith.constant dense<0.000000e+00> : vector<256x32xf32>
    %33 = tpu.matmul %31, %32, %cst_22 {dimension_numbers = #tpu.dot_dimension_numbers<[1], [0], [0], [1], [0, 0, 1, 1], [], []>} : vector<256x64xbf16>, vector<64x32xbf16>, vector<256x32xf32> -> vector<256x32xf32>
    %c0_23 = arith.constant 0 : index
    %c0_24 = arith.constant 0 : index
    %34 = vector.load %arg10[%c0_23, %c0_24] : memref<1x32xf32, #tpu.memory_space<vmem>>, vector<1x32xf32>
    %35 = vector.broadcast %34 : vector<1x32xf32> to vector<256x32xf32>
    %36 = arith.addf %33, %35 : vector<256x32xf32>
    %cst_25 = arith.constant dense<0xFF800000> : vector<256xf32>
    %37 = vector.multi_reduction <maximumf>, %36, %cst_25 [1] : vector<256x32xf32> to vector<256xf32>
    %38 = vector.shape_cast %37 : vector<256xf32> to vector<256x1xf32>
    %39 = vector.broadcast %38 : vector<256x1xf32> to vector<256x32xf32>
    %40 = arith.subf %36, %39 : vector<256x32xf32>
    %41 = math.exp %40 : vector<256x32xf32>
    %cst_26 = arith.constant dense<0.000000e+00> : vector<256xf32>
    %42 = vector.multi_reduction <add>, %41, %cst_26 [1] : vector<256x32xf32> to vector<256xf32>
    %43 = vector.shape_cast %42 : vector<256xf32> to vector<256x1xf32>
    %44 = vector.broadcast %43 : vector<256x1xf32> to vector<256x32xf32>
    %45 = arith.divf %41, %44 : vector<256x32xf32>
    %46 = tpu.concatenate %45, %13 in 1 : vector<256x32xf32>, vector<256x32xf32> -> vector<256x64xf32>
    %47 = arith.truncf %46 : vector<256x64xf32> to vector<256x64xbf16>
    %c0_27 = arith.constant 0 : index
    %c0_28 = arith.constant 0 : index
    %48 = vector.load %arg11[%c0_27, %c0_28] : memref<256x64xbf16, #tpu.memory_space<vmem>>, vector<256x64xbf16>
    tpu.vector_store %arg11[%c0_27, %c0_28], %47 {strides = array<i32>} : memref<256x64xbf16, #tpu.memory_space<vmem>>, vector<256x64xbf16>,
    return
  }
  func.func @transform_0(%arg0: i32) -> (i32, i32) {
    %c0_i32 = arith.constant 0 : i32
    %c0_i32_0 = arith.constant 0 : i32
    return %arg0, %c0_i32 : i32, i32
  }
  func.func @transform_1(%arg0: i32) -> (i32, i32) {
    %c0_i32 = arith.constant 0 : i32
    %c0_i32_0 = arith.constant 0 : i32
    return %arg0, %c0_i32 : i32, i32
  }
  func.func @transform_2(%arg0: i32) -> (i32, i32) {
    %c0_i32 = arith.constant 0 : i32
    %c0_i32_0 = arith.constant 0 : i32
    %c0_i32_1 = arith.constant 0 : i32
    return %c0_i32, %c0_i32_0 : i32, i32
  }
  func.func @transform_3(%arg0: i32) -> (i32, i32) {
    %c0_i32 = arith.constant 0 : i32
    %c0_i32_0 = arith.constant 0 : i32
    %c0_i32_1 = arith.constant 0 : i32
    return %c0_i32, %c0_i32_0 : i32, i32
  }
  func.func @transform_4(%arg0: i32) -> (i32, i32) {
    %c0_i32 = arith.constant 0 : i32
    %c0_i32_0 = arith.constant 0 : i32
    %c0_i32_1 = arith.constant 0 : i32
    return %c0_i32, %c0_i32_0 : i32, i32
  }
  func.func @transform_5(%arg0: i32) -> (i32, i32) {
    %c0_i32 = arith.constant 0 : i32
    %c0_i32_0 = arith.constant 0 : i32
    %c0_i32_1 = arith.constant 0 : i32
    return %c0_i32, %c0_i32_0 : i32, i32
  }
  func.func @transform_6(%arg0: i32) -> (i32, i32) {
    %c0_i32 = arith.constant 0 : i32
    %c0_i32_0 = arith.constant 0 : i32
    %c0_i32_1 = arith.constant 0 : i32
    return %c0_i32, %c0_i32_0 : i32, i32
  }
  func.func @transform_7(%arg0: i32) -> (i32, i32) {
    %c0_i32 = arith.constant 0 : i32
    %c0_i32_0 = arith.constant 0 : i32
    %c0_i32_1 = arith.constant 0 : i32
    return %c0_i32, %c0_i32_0 : i32, i32
  }
  func.func @transform_8(%arg0: i32) -> (i32, i32) {
    %c0_i32 = arith.constant 0 : i32
    %c0_i32_0 = arith.constant 0 : i32
    %c0_i32_1 = arith.constant 0 : i32
    return %c0_i32, %c0_i32_0 : i32, i32
  }
  func.func @transform_9(%arg0: i32) -> (i32, i32) {
    %c0_i32 = arith.constant 0 : i32
    %c0_i32_0 = arith.constant 0 : i32
    %c0_i32_1 = arith.constant 0 : i32
    return %c0_i32, %c0_i32_0 : i32, i32
  }
  func.func @transform_10(%arg0: i32) -> (i32, i32) {
    %c0_i32 = arith.constant 0 : i32
    %c0_i32_0 = arith.constant 0 : i32
    return %arg0, %c0_i32 : i32, i32
  }
}

</mosaic_0001>

<bundles_post_ra>
// kernel: tpu_custom_call.1
= control target key start
LH: loop header
LB: loop body
LE: loop exit
PB: predicated region body
PF: predicated region fallthrough
CT: control target
= control target key end

     0   :  { %s3508_s13 = smov 0   ;;  %s4496_s0 = inlined_call_operand.vmem [shape: bf16[512,32], index: 0, kind: input, shape index: {}]   ;;  %s4497_s1 = inlined_call_operand.vmem [shape: bf16[512,16], index: 1, kind: input, shape index: {}]   ;;  %s4498_s2 = inlined_call_operand.vmem [shape: bf16[32,64], index: 2, kind: input, shape index: {}]   ;;  %s4499_s3 = inlined_call_operand.vmem [shape: f32[1,64], index: 3, kind: input, shape index: {}]   ;;  %s4500_s4 = inlined_call_operand.vmem [shape: bf16[64,32], index: 4, kind: input, shape index: {}]   ;;  %s4501_s5 = inlined_call_operand.vmem [shape: f32[1,32], index: 5, kind: input, shape index: {}]   ;;  %s4502_s6 = inlined_call_operand.vmem [shape: bf16[16,64], index: 6, kind: input, shape index: {}]   ;;  %s4503_s7 = inlined_call_operand.vmem [shape: f32[1,64], index: 7, kind: input, shape index: {}]   ;;  %s4504_s8 = inlined_call_operand.vmem [shape: bf16[64,32], index: 8, kind: input, shape index: {}]   ;;  %s4505_s9 = inlined_call_operand.vmem [shape: f32[1,32], index: 9, kind: input, shape index: {}]   ;;  %s4506_s10 = inlined_call_operand.vmem [shape: bf16[512,64], index: 10, kind: output, shape index: {}]  }
   0x1 LB: > { %s2658_s14 = sadd.s32 4294967295, %s3449_s13   ;;  %p2662_p0 = scmp.ge.s32.totalorder %s3449_s13, 1  ;;  %s3449_s13 = sphi %s3508_s13, %s20_s13  }
   0x2   : > { %p324_p1 = scmp.lt.s32.totalorder %s3449_s13, 3 }
   0x4   : > { %p325_p2 = pnand %p2662_p0, %p324_p1 }
   0x5   : > { %v3224_v0 = vld [vmem:[%s4498_s2] sm:$0xff] (!%p325_p2)   ;;  %s2663_s17 = sshll.u32 (!%p325_p2), %s2658_s14, 5  ;;  %v3225_v1 = vld [vmem:[%s4498_s2 + $0x8] sm:$0xff] (!%p325_p2)   ;;  %vm521_vm0 = vcmask (!%p325_p2), 261120   ;;  %v3244_v20 = vld [vmem:[%s4500_s4 + $0x10] sm:$0xff] (!%p325_p2)   ;;  %vm818_vm1 = vcmask (!%p325_p2), 523264  }
   0x6   : > { %328 = sbr.rel (%p325_p2) target bundleno = 1418 (0x58a), region = 60  ;;  %p368_p3 = scmp.lt.s32.totalorder (!%p325_p2), %s2663_s17, 63  ;;  %2984 = vmatprep.subr.bf16.mxu0 (!%p325_p2), %v3224_v0  ;;  %v3242_v2 = vld [vmem:[%s4500_s4] sm:$0xff] (!%p325_p2)   ;;  %v3243_v3 = vld [vmem:[%s4500_s4 + $0x8] sm:$0xff] (!%p325_p2)   ;;  %v3245_v21 = vld [vmem:[%s4500_s4 + $0x18] sm:$0xff] (!%p325_p2)   ;;  %vm1411_vm2 = vcmask (!%p325_p2), 130048  }
   0x7   : > { %2985 = vmatpush3.bf16.msra.mxu0 (!%p325_p2), %v3224_v0  ;;  %3020 = vmatprep.subr.bf16.mxu1 (!%p325_p2), %v3242_v2  ;;  %v3577_v22 = vld [vmem:[%s4499_s3] ss:$0 sm:$0xff] (!%p325_p2)  ;;  %s3451_s19 = smov (!%p325_p2), 112   ;;  %s3452_s20 = smov (!%p325_p2), 32   ;;  %vm2557_vm3 = vcmask (!%p325_p2), 519168  }
   0x8   : > { %2986 = vmatprep.subr.bf16.mxu0 (!%p325_p2), %v3225_v1  ;;  %3021 = vmatpush3.bf16.msra.mxu1 (!%p325_p2), %v3242_v2 }
   0x9   : > { %3022 = vmatprep.subr.bf16.mxu1 (!%p325_p2), %v3243_v3 }
   0xb   : > { %2987 = vmatpush3.bf16.msra.mxu0 (!%p325_p2), %v3225_v1 }
   0xc   : > { %3023 = vmatpush3.bf16.msra.mxu1 (!%p325_p2), %v3243_v3 }
   0xd   : > { %s4508_s17 = smov (!%p368_p3, %s2663_s17), 63  ;;  %3024 = vmatprep.subr.bf16.mxu1 %v3244_v20 }
   0xe   : > { %s3528_s24 = sshll.u32 %s4508_s17, 2 }
   0xf   : > { %s3534_s27 = scalar_lea.vmem %s4496_s0, %s3528_s24  ;;  %s3847_s12 = scalar_lea.vmem %s4497_s1, %s3528_s24 }
  0x10   : > { %v3226_v4 = vld [vmem:[%s3534_s27] sm:$0xff]   ;;  %v3227_v5 = vld [vmem:[%s3534_s27 + $0x8] sm:$0xff]   ;;  %v3228_v6 = vld [vmem:[%s3534_s27 + $0x10] sm:$0xff]   ;;  %3025 = vmatpush3.bf16.msra.mxu1 %v3244_v20 }
  0x11   : > { %2988 = vmatprep.mubr.msk.bf16.mxu0 %vm521_vm0, %v3226_v4  ;;  %v3229_v7 = vld [vmem:[%s3534_s27 + $0x18] sm:$0xff]   ;;  %v3230_v8 = vld [vmem:[%s3534_s27 + $0x20] sm:$0xff]   ;;  %v3231_v9 = vld [vmem:[%s3534_s27 + $0x28] sm:$0xff]   ;;  %3026 = vmatprep.subr.bf16.mxu1 %v3245_v21 }
  0x12   : > { %2989 = vmatmul.mubr.msk.bf16.vlgmr.msra.gmra.mrb[0].mxu0 %vm521_vm0, %v3227_v5  ;;  %v3232_v10 = vld [vmem:[%s3534_s27 + $0x30] sm:$0xff]   ;;  %v3233_v11 = vld [vmem:[%s3534_s27 + $0x38] sm:$0xff]   ;;  %v3234_v12 = vld [vmem:[%s3534_s27 + $0x40] sm:$0xff]  }
  0x13   : > { %2992 = vmatprep.mubr.msk.bf16.mxu0 %vm521_vm0, %v3228_v6  ;;  %v3235_v13 = vld [vmem:[%s3534_s27 + $0x48] sm:$0xff]   ;;  %v3236_v14 = vld [vmem:[%s3534_s27 + $0x50] sm:$0xff]   ;;  %v3237_v15 = vld [vmem:[%s3534_s27 + $0x58] sm:$0xff]  }
  0x14   : > { %v3238_v16 = vld [vmem:[%s3534_s27 + $0x60] sm:$0xff]   ;;  %v3239_v17 = vld [vmem:[%s3534_s27 + $0x68] sm:$0xff]   ;;  %v3240_v18 = vld [vmem:[%s3534_s27 + $0x70] sm:$0xff]   ;;  %3027 = vmatpush3.bf16.msra.mxu1 %v3245_v21 }
  0x15   : > { %v3241_v19 = vld [vmem:[%s3534_s27 + $0x78] sm:$0xff]  }
  0x1a   : > { %2993 = vmatmul.mubr.msk.bf16.gmra.mrb[4].mxu0 %vm521_vm0, %v3229_v7 }
  0x1b   : > { %2996 = vmatprep.mubr.msk.bf16.mxu0 %vm521_vm0, %v3230_v8 }
  0x22   : > { %2997 = vmatmul.mubr.msk.bf16.gmra.mrb[8].mxu0 %vm521_vm0, %v3231_v9 }
  0x23   : > { %3000 = vmatprep.mubr.msk.bf16.mxu0 %vm521_vm0, %v3232_v10 }
  0x2a   : > { %3001 = vmatmul.mubr.msk.bf16.gmra.mrb[12].mxu0 %vm521_vm0, %v3233_v11 }
  0x2b   : > { %3004 = vmatprep.mubr.msk.bf16.mxu0 %vm521_vm0, %v3234_v12 }
  0x32   : > { %3005 = vmatmul.mubr.msk.bf16.gmra.mrb[16].mxu0 %vm521_vm0, %v3235_v13 }
  0x33   : > { %3008 = vmatprep.mubr.msk.bf16.mxu0 %vm521_vm0, %v3236_v14 }
  0x3a   : > { %3009 = vmatmul.mubr.msk.bf16.gmra.mrb[20].mxu0 %vm521_vm0, %v3237_v15 }
  0x3b   : > { %3012 = vmatprep.mubr.msk.bf16.mxu0 %vm521_vm0, %v3238_v16 }
  0x42   : > { %3013 = vmatmul.mubr.msk.bf16.gmra.mrb[24].mxu0 %vm521_vm0, %v3239_v17 }
  0x43   : > { %3016 = vmatprep.mubr.msk.bf16.mxu0 %vm521_vm0, %v3240_v18 }
  0x4a   : > { %3017 = vmatmul.mubr.msk.bf16.gmra.mrb[28].mxu0 %vm521_vm0, %v3241_v19 }
  0xe5   : > { %v2990_v23 = vpop.f32.mrb[0].mxu0 }
  0xe6   : > { %v613_v24 = vadd.f32 %v2990_v23, %v3577_v22  ;;  %v604_v25 = vpop.f32.mrb[1].mxu0 }
  0xe7   : > { %v605_v26 = vadd.f32 %v3577_v22, %v604_v25  ;;  %v2991_v27 = vpop.f32.mrb[2].mxu0 }
  0xe8   : > { %v616_v28 = vadd.f32 %v2991_v27, %v3577_v22  ;;  %v607_v29 = vpop.f32.mrb[3].mxu0  ;;  %v733_v31 = vmax.f32 %v613_v24, 0.0 }
  0xe9   : > { %v608_v30 = vadd.f32 %v3577_v22, %v607_v29  ;;  %v731_v33 = vmax.f32 %v605_v26, 0.0 }
  0xea   : > { %v734_v32 = vmax.f32 %v616_v28, 0.0 }
  0xeb   : > { %v732_v34 = vmax.f32 %v608_v30, 0.0 }
  0xec   : > { %v764_v35 = vpack.c.bf16 %v734_v32, %v733_v31 }
  0xed   : > { %v2994_v36 = vpop.f32.mrb[4].mxu0  ;;  %v763_v37 = vpack.c.bf16 %v732_v34, %v731_v33 }
  0xee   : > { %v629_v38 = vadd.f32 %v2994_v36, %v3577_v22  ;;  %v620_v39 = vpop.f32.mrb[5].mxu0 }
  0xef   : > { %v621_v40 = vadd.f32 %v3577_v22, %v620_v39  ;;  %v2995_v41 = vpop.f32.mrb[6].mxu0  ;;  %3028 = vmatprep.mubr.msk.bf16.mxu1 %vm818_vm1, %v763_v37 }
  0xf0   : > { %v737_v42 = vmax.f32 %v629_v38, 0.0  ;;  %v632_v43 = vadd.f32 %v2995_v41, %v3577_v22  ;;  %v623_v44 = vpop.f32.mrb[7].mxu0  ;;  %3029 = vmatmul.mubr.msk.bf16.vlgmr.msra.gmra.mrb[0].mxu1 %vm818_vm1, %v764_v35 }
  0xf1   : > { %v735_v45 = vmax.f32 %v621_v40, 0.0  ;;  %v624_v46 = vadd.f32 %v3577_v22, %v623_v44 }
  0xf2   : > { %v738_v47 = vmax.f32 %v632_v43, 0.0 }
  0xf3   : > { %v736_v48 = vmax.f32 %v624_v46, 0.0 }
  0xf4   : > { %v766_v49 = vpack.c.bf16 %v738_v47, %v737_v42 }
  0xf5   : > { %v765_v50 = vpack.c.bf16 %v736_v48, %v735_v45  ;;  %v2998_v51 = vpop.f32.mrb[8].mxu0 }
  0xf6   : > { %v645_v52 = vadd.f32 %v2998_v51, %v3577_v22  ;;  %v636_v53 = vpop.f32.mrb[9].mxu0 }
  0xf7   : > { %v637_v54 = vadd.f32 %v3577_v22, %v636_v53  ;;  %v2999_v55 = vpop.f32.mrb[10].mxu0  ;;  %3032 = vmatprep.mubr.msk.bf16.mxu1 %vm818_vm1, %v765_v50 }
  0xf8   : > { %v741_v56 = vmax.f32 %v645_v52, 0.0  ;;  %v648_v57 = vadd.f32 %v2999_v55, %v3577_v22  ;;  %v639_v58 = vpop.f32.mrb[11].mxu0  ;;  %3033 = vmatmul.mubr.msk.bf16.gmra.mrb[4].mxu1 %vm818_vm1, %v766_v49 }
  0xf9   : > { %v739_v59 = vmax.f32 %v637_v54, 0.0  ;;  %v640_v60 = vadd.f32 %v3577_v22, %v639_v58 }
  0xfa   : > { %v742_v61 = vmax.f32 %v648_v57, 0.0 }
  0xfb   : > { %v740_v62 = vmax.f32 %v640_v60, 0.0 }
  0xfc   : > { %v768_v63 = vpack.c.bf16 %v742_v61, %v741_v56 }
  0xfd   : > { %v767_v0 = vpack.c.bf16 %v740_v62, %v739_v59  ;;  %v3002_v1 = vpop.f32.mrb[12].mxu0 }
  0xfe   : > { %v661_v2 = vadd.f32 %v3002_v1, %v3577_v22  ;;  %v652_v3 = vpop.f32.mrb[13].mxu0 }
  0xff   : > { %v653_v4 = vadd.f32 %v3577_v22, %v652_v3  ;;  %v3003_v5 = vpop.f32.mrb[14].mxu0  ;;  %3036 = vmatprep.mubr.msk.bf16.mxu1 %vm818_vm1, %v767_v0 }
 0x100   : > { %v745_v6 = vmax.f32 %v661_v2, 0.0  ;;  %v664_v7 = vadd.f32 %v3003_v5, %v3577_v22  ;;  %v655_v8 = vpop.f32.mrb[15].mxu0  ;;  %3037 = vmatmul.mubr.msk.bf16.gmra.mrb[8].mxu1 %vm818_vm1, %v768_v63 }
 0x101   : > { %v743_v9 = vmax.f32 %v653_v4, 0.0  ;;  %v656_v10 = vadd.f32 %v3577_v22, %v655_v8  ;;  %v3246_v8 = vld [vmem:[%s4502_s6] sm:$0xff]  }
 0x102   : > { %v746_v11 = vmax.f32 %v664_v7, 0.0  ;;  %3060 = vmatprep.subr.bf16.mxu0 %v3246_v8 }
 0x103   : > { %v744_v12 = vmax.f32 %v656_v10, 0.0  ;;  %3061 = vmatpush3.bf16.msra.mxu0 %v3246_v8 }
 0x104   : > { %v770_v13 = vpack.c.bf16 %v746_v11, %v745_v6 }
 0x105   : > { %v769_v14 = vpack.c.bf16 %v744_v12, %v743_v9  ;;  %v3006_v15 = vpop.f32.mrb[16].mxu0  ;;  %v3633_v9 = vld [vmem:[%s4501_s5] ss:$0 sm:$0xff] }
 0x106   : > { %v677_v16 = vadd.f32 %v3006_v15, %v3577_v22  ;;  %v668_v17 = vpop.f32.mrb[17].mxu0 }
 0x107   : > { %v669_v18 = vadd.f32 %v3577_v22, %v668_v17  ;;  %v3007_v19 = vpop.f32.mrb[18].mxu0  ;;  %3040 = vmatprep.mubr.msk.bf16.mxu1 %vm818_vm1, %v769_v14 }
 0x108   : > { %v749_v20 = vmax.f32 %v677_v16, 0.0  ;;  %v680_v21 = vadd.f32 %v3007_v19, %v3577_v22  ;;  %v671_v23 = vpop.f32.mrb[19].mxu0  ;;  %3041 = vmatmul.mubr.msk.bf16.gmra.mrb[12].mxu1 %vm818_vm1, %v770_v13 }
 0x109   : > { %v747_v24 = vmax.f32 %v669_v18, 0.0  ;;  %v672_v25 = vadd.f32 %v3577_v22, %v671_v23 }
 0x10a   : > { %v750_v26 = vmax.f32 %v680_v21, 0.0 }
 0x10b   : > { %v748_v27 = vmax.f32 %v672_v25, 0.0 }
 0x10c   : > { %v772_v28 = vpack.c.bf16 %v750_v26, %v749_v20 }
 0x10d   : > { %v771_v29 = vpack.c.bf16 %v748_v27, %v747_v24  ;;  %v3010_v30 = vpop.f32.mrb[20].mxu0 }
 0x10e   : > { %v693_v31 = vadd.f32 %v3010_v30, %v3577_v22  ;;  %v684_v32 = vpop.f32.mrb[21].mxu0 }
 0x10f   : > { %v685_v33 = vadd.f32 %v3577_v22, %v684_v32  ;;  %v3011_v34 = vpop.f32.mrb[22].mxu0  ;;  %3044 = vmatprep.mubr.msk.bf16.mxu1 %vm818_vm1, %v771_v29 }
 0x110   : > { %v753_v35 = vmax.f32 %v693_v31, 0.0  ;;  %v696_v36 = vadd.f32 %v3011_v34, %v3577_v22  ;;  %v687_v37 = vpop.f32.mrb[23].mxu0  ;;  %3045 = vmatmul.mubr.msk.bf16.gmra.mrb[16].mxu1 %vm818_vm1, %v772_v28 }
 0x111   : > { %v751_v38 = vmax.f32 %v685_v33, 0.0  ;;  %v688_v39 = vadd.f32 %v3577_v22, %v687_v37 }
 0x112   : > { %v754_v40 = vmax.f32 %v696_v36, 0.0 }
 0x113   : > { %v752_v41 = vmax.f32 %v688_v39, 0.0 }
 0x114   : > { %v774_v42 = vpack.c.bf16 %v754_v40, %v753_v35 }
 0x115   : > { %v773_v43 = vpack.c.bf16 %v752_v41, %v751_v38  ;;  %v3014_v44 = vpop.f32.mrb[24].mxu0 }
 0x116   : > { %v709_v45 = vadd.f32 %v3014_v44, %v3577_v22  ;;  %v700_v46 = vpop.f32.mrb[25].mxu0 }
 0x117   : > { %v701_v47 = vadd.f32 %v3577_v22, %v700_v46  ;;  %v3015_v48 = vpop.f32.mrb[26].mxu0  ;;  %3048 = vmatprep.mubr.msk.bf16.mxu1 %vm818_vm1, %v773_v43 }
 0x118   : > { %v757_v49 = vmax.f32 %v709_v45, 0.0  ;;  %v712_v50 = vadd.f32 %v3015_v48, %v3577_v22  ;;  %v703_v51 = vpop.f32.mrb[27].mxu0  ;;  %3049 = vmatmul.mubr.msk.bf16.gmra.mrb[20].mxu1 %vm818_vm1, %v774_v42 }
 0x119   : > { %v755_v52 = vmax.f32 %v701_v47, 0.0  ;;  %v704_v53 = vadd.f32 %v3577_v22, %v703_v51 }
 0x11a   : > { %v758_v54 = vmax.f32 %v712_v50, 0.0 }
 0x11b   : > { %v756_v55 = vmax.f32 %v704_v53, 0.0 }
 0x11c   : > { %v776_v56 = vpack.c.bf16 %v758_v54, %v757_v49 }
 0x11d   : > { %v775_v57 = vpack.c.bf16 %v756_v55, %v755_v52  ;;  %v3018_v58 = vpop.f32.mrb[28].mxu0 }
 0x11e   : > { %v725_v59 = vadd.f32 %v3018_v58, %v3577_v22  ;;  %v716_v60 = vpop.f32.mrb[29].mxu0 }
 0x11f   : > { %v717_v61 = vadd.f32 %v3577_v22, %v716_v60  ;;  %v3019_v62 = vpop.f32.mrb[30].mxu0  ;;  %3052 = vmatprep.mubr.msk.bf16.mxu1 %vm818_vm1, %v775_v57 }
 0x120   : > { %v761_v63 = vmax.f32 %v725_v59, 0.0  ;;  %v728_v0 = vadd.f32 %v3019_v62, %v3577_v22  ;;  %v719_v1 = vpop.f32.mrb[31].mxu0  ;;  %3053 = vmatmul.mubr.msk.bf16.gmra.mrb[24].mxu1 %vm818_vm1, %v776_v56 }
 0x121   : > { %v759_v2 = vmax.f32 %v717_v61, 0.0  ;;  %v720_v3 = vadd.f32 %v3577_v22, %v719_v1 }
 0x122   : > { %v762_v4 = vmax.f32 %v728_v0, 0.0 }
 0x123   : > { %v760_v5 = vmax.f32 %v720_v3, 0.0 }
 0x124   : > { %v778_v6 = vpack.c.bf16 %v762_v4, %v761_v63 }
 0x125   : > { %v777_v7 = vpack.c.bf16 %v760_v5, %v759_v2 }
 0x127   : > { %3056 = vmatprep.mubr.msk.bf16.mxu1 %vm818_vm1, %v777_v7 }
 0x128   : > { %3057 = vmatmul.mubr.msk.bf16.gmra.mrb[28].mxu1 %vm818_vm1, %v778_v6 }
 0x1c3   : > { %v3030_v22 = vpop.f32.mrb[0].mxu1 }
 0x1c4   : > { %v3636_v10 = vadd.f32 %v3030_v22, %v3633_v9  ;;  %v901_v11 = vpop.f32.mrb[1].mxu1 }
 0x1c5   : > { %v3639_v12 = vadd.f32 %v3633_v9, %v901_v11  ;;  %v3031_v13 = vpop.f32.mrb[2].mxu1 }
 0x1c6   : > { %v1094_v14 = vmul.f32 0.5, %v3636_v10  ;;  %v3643_v15 = vadd.f32 %v3031_v13, %v3633_v9  ;;  %v904_v16 = vpop.f32.mrb[3].mxu1 }
 0x1c7   : > { %v1092_v17 = vmul.f32 0.5, %v3639_v12  ;;  %v3647_v18 = vadd.f32 %v3633_v9, %v904_v16 }
 0x1c8   : > { %v1128_v19 = vmul.f32 1.442695, %v1094_v14  ;;  %v1095_v20 = vmul.f32 0.5, %v3643_v15 }
 0x1c9   : > { %v1124_v21 = vmul.f32 1.442695, %v1092_v17  ;;  %v1093_v23 = vmul.f32 0.5, %v3647_v18 }
 0x1ca   : > { %3251 = vpow2.f32 %v1128_v19  ;;  %v1130_v24 = vmul.f32 1.442695, %v1095_v20 }
 0x1cb   : > { %3253 = vpow2.f32 %v1124_v21  ;;  %v1126_v25 = vmul.f32 1.442695, %v1093_v23  ;;  %v3034_v26 = vpop.f32.mrb[4].mxu1 }
 0x1cc   : > { %v3652_v27 = vadd.f32 %v3034_v26, %v3633_v9  ;;  %v917_v28 = vpop.f32.mrb[5].mxu1  ;;  %3255 = vpow2.f32 %v1130_v24 }
 0x1cd   : > { %v3655_v29 = vadd.f32 %v3633_v9, %v917_v28  ;;  %v3035_v30 = vpop.f32.mrb[6].mxu1  ;;  %3257 = vpow2.f32 %v1126_v25 }
 0x1ce   : > { %v3658_v31 = vadd.f32 %v3035_v30, %v3633_v9  ;;  %v920_v32 = vpop.f32.mrb[7].mxu1  ;;  %v1098_v33 = vmul.f32 0.5, %v3652_v27 }
 0x1cf   : > { %v1096_v34 = vmul.f32 0.5, %v3655_v29  ;;  %v3663_v35 = vadd.f32 %v3633_v9, %v920_v32 }
 0x1d0   : > { %v1099_v37 = vmul.f32 0.5, %v3658_v31  ;;  %v1136_v39 = vmul.f32 1.442695, %v1098_v33 }
 0x1d1   : > { %v1132_v36 = vmul.f32 1.442695, %v1096_v34  ;;  %v1097_v38 = vmul.f32 0.5, %v3663_v35 }
 0x1d2   : > { %v1138_v46 = vmul.f32 1.442695, %v1099_v37 }
 0x1d3   : > { %3259 = vpow2.f32 %v1132_v36  ;;  %v1134_v40 = vmul.f32 1.442695, %v1097_v38  ;;  %v3038_v41 = vpop.f32.mrb[8].mxu1 }
 0x1d4   : > { %v3252_v42 = vpop.eup %3251  ;;  %v3668_v43 = vadd.f32 %v3038_v41, %v3633_v9  ;;  %v933_v44 = vpop.f32.mrb[9].mxu1 }
 0x1d5   : > { %v3254_v45 = vpop.eup %3253  ;;  %3261 = vpow2.f32 %v1134_v40  ;;  %v3671_v47 = vadd.f32 %v3633_v9, %v933_v44  ;;  %1224 = vrot.lane.b32.xlu1 %v3252_v42, %s3451_s19  ;;  %v3039_v48 = vpop.f32.mrb[10].mxu1 }
 0x1d6   : > { %v3675_v49 = vadd.f32 %v3039_v48, %v3633_v9  ;;  %v936_v50 = vpop.f32.mrb[11].mxu1  ;;  %1220 = vrot.lane.b32.xlu0 %v3254_v45, %s3451_s19  ;;  %3263 = vpow2.f32 %v1136_v39  ;;  %v1102_v51 = vmul.f32 0.5, %v3668_v43  ;;  %v3256_v54 = vpop.eup %3255 }
 0x1d7   : > { %v1100_v52 = vmul.f32 0.5, %v3671_v47  ;;  %v3681_v53 = vadd.f32 %v3633_v9, %v936_v50  ;;  %v3258_v55 = vpop.eup %3257  ;;  %3265 = vpow2.f32 %v1138_v46 }
 0x1d8   : > { %v1103_v57 = vmul.f32 0.5, %v3675_v49  ;;  %v1144_v59 = vmul.f32 1.442695, %v1102_v51 }
 0x1d9   : > { %v1140_v56 = vmul.f32 1.442695, %v1100_v52  ;;  %v1101_v58 = vmul.f32 0.5, %v3681_v53  ;;  %1226 = vrot.lane.b32.xlu1 %v3256_v54, %s3451_s19 }
 0x1da   : > { %1222 = vrot.lane.b32.xlu0 %v3258_v55, %s3451_s19  ;;  %v1146_v1 = vmul.f32 1.442695, %v1103_v57 }
 0x1db   : > { %3267 = vpow2.f32 %v1140_v56  ;;  %v1142_v60 = vmul.f32 1.442695, %v1101_v58  ;;  %v3042_v61 = vpop.f32.mrb[12].mxu1 }
 0x1dc   : > { %v3688_v62 = vadd.f32 %v3042_v61, %v3633_v9  ;;  %v949_v63 = vpop.f32.mrb[13].mxu1 }
 0x1dd   : > { %v3260_v0 = vpop.eup %3259  ;;  %3269 = vpow2.f32 %v1142_v60  ;;  %v3691_v2 = vadd.f32 %v3633_v9, %v949_v63  ;;  %v3043_v3 = vpop.f32.mrb[14].mxu1 }
 0x1de   : > { %v3694_v4 = vadd.f32 %v3043_v3, %v3633_v9  ;;  %v952_v5 = vpop.f32.mrb[15].mxu1  ;;  %1228 = vrot.lane.b32.xlu0 %v3260_v0, %s3451_s19  ;;  %3271 = vpow2.f32 %v1144_v59  ;;  %v1106_v7 = vmul.f32 0.5, %v3688_v62 }
 0x1df   : > { %v3262_v6 = vpop.eup %3261  ;;  %v1104_v8 = vmul.f32 0.5, %v3691_v2  ;;  %v3700_v22 = vadd.f32 %v3633_v9, %v952_v5  ;;  %3273 = vpow2.f32 %v1146_v1 }
 0x1e0   : > { %1230 = vrot.lane.b32.xlu1 %v3262_v6, %s3451_s19  ;;  %v3264_v11 = vpop.eup %3263  ;;  %v1107_v14 = vmul.f32 0.5, %v3694_v4  ;;  %v1152_v19 = vmul.f32 1.442695, %v1106_v7 }
 0x1e1   : > { %v1148_v13 = vmul.f32 1.442695, %v1104_v8  ;;  %v1105_v16 = vmul.f32 0.5, %v3700_v22  ;;  %v3266_v17 = vpop.eup %3265 }
 0x1e2   : > { %1232 = vrot.lane.b32.xlu0 %v3264_v11, %s3451_s19  ;;  %v1154_v26 = vmul.f32 1.442695, %v1107_v14 }
 0x1e3   : > { %3275 = vpow2.f32 %v1148_v13  ;;  %v1150_v20 = vmul.f32 1.442695, %v1105_v16  ;;  %v3046_v21 = vpop.f32.mrb[16].mxu1 }
 0x1e4   : > { %v3707_v23 = vadd.f32 %v3046_v21, %v3633_v9  ;;  %v965_v24 = vpop.f32.mrb[17].mxu1  ;;  %1234 = vrot.lane.b32.xlu1 %v3266_v17, %s3451_s19 }
 0x1e5   : > { %v3268_v25 = vpop.eup %3267  ;;  %3277 = vpow2.f32 %v1150_v20  ;;  %v3711_v28 = vadd.f32 %v3633_v9, %v965_v24  ;;  %v3047_v30 = vpop.f32.mrb[18].mxu1 }
 0x1e6   : > { %v3714_v32 = vadd.f32 %v3047_v30, %v3633_v9  ;;  %v968_v33 = vpop.f32.mrb[19].mxu1  ;;  %1236 = vrot.lane.b32.xlu0 %v3268_v25, %s3451_s19  ;;  %3279 = vpow2.f32 %v1152_v19  ;;  %v1110_v36 = vmul.f32 0.5, %v3707_v23 }
 0x1e7   : > { %v3270_v34 = vpop.eup %3269  ;;  %v1108_v37 = vmul.f32 0.5, %v3711_v28  ;;  %v3720_v38 = vadd.f32 %v3633_v9, %v968_v33  ;;  %3281 = vpow2.f32 %v1154_v26 }
 0x1e8   : > { %1238 = vrot.lane.b32.xlu1 %v3270_v34, %s3451_s19  ;;  %v3272_v39 = vpop.eup %3271  ;;  %v1111_v41 = vmul.f32 0.5, %v3714_v32  ;;  %v1160_v45 = vmul.f32 1.442695, %v1110_v36 }
 0x1e9   : > { %v1156_v40 = vmul.f32 1.442695, %v1108_v37  ;;  %v1109_v42 = vmul.f32 0.5, %v3720_v38  ;;  %v3274_v44 = vpop.eup %3273 }
 0x1ea   : > { %1240 = vrot.lane.b32.xlu0 %v3272_v39, %s3451_s19  ;;  %v1162_v54 = vmul.f32 1.442695, %v1111_v41 }
 0x1eb   : > { %3283 = vpow2.f32 %v1156_v40  ;;  %v1158_v46 = vmul.f32 1.442695, %v1109_v42  ;;  %v3050_v48 = vpop.f32.mrb[20].mxu1 }
 0x1ec   : > { %v3727_v50 = vadd.f32 %v3050_v48, %v3633_v9  ;;  %v981_v51 = vpop.f32.mrb[21].mxu1  ;;  %1242 = vrot.lane.b32.xlu1 %v3274_v44, %s3451_s19 }
 0x1ed   : > { %v3276_v52 = vpop.eup %3275  ;;  %3285 = vpow2.f32 %v1158_v46  ;;  %v3731_v55 = vadd.f32 %v3633_v9, %v981_v51  ;;  %v3051_v56 = vpop.f32.mrb[22].mxu1 }
 0x1ee   : > { %v3734_v57 = vadd.f32 %v3051_v56, %v3633_v9  ;;  %v984_v58 = vpop.f32.mrb[23].mxu1  ;;  %1244 = vrot.lane.b32.xlu0 %v3276_v52, %s3451_s19  ;;  %3287 = vpow2.f32 %v1160_v45  ;;  %v1114_v60 = vmul.f32 0.5, %v3727_v50 }
 0x1ef   : > { %v3278_v59 = vpop.eup %3277  ;;  %v1112_v61 = vmul.f32 0.5, %v3731_v55  ;;  %v3740_v63 = vadd.f32 %v3633_v9, %v984_v58  ;;  %3289 = vpow2.f32 %v1162_v54 }
 0x1f0   : > { %1246 = vrot.lane.b32.xlu1 %v3278_v59, %s3451_s19  ;;  %v3280_v0 = vpop.eup %3279  ;;  %v1115_v3 = vmul.f32 0.5, %v3734_v57  ;;  %v1168_v7 = vmul.f32 1.442695, %v1114_v60 }
 0x1f1   : > { %v1164_v1 = vmul.f32 1.442695, %v1112_v61  ;;  %v1113_v5 = vmul.f32 0.5, %v3740_v63  ;;  %v3282_v6 = vpop.eup %3281 }
 0x1f2   : > { %1248 = vrot.lane.b32.xlu0 %v3280_v0, %s3451_s19  ;;  %v1170_v17 = vmul.f32 1.442695, %v1115_v3 }
 0x1f3   : > { %3291 = vpow2.f32 %v1164_v1  ;;  %v1166_v8 = vmul.f32 1.442695, %v1113_v5  ;;  %v3054_v11 = vpop.f32.mrb[24].mxu1 }
 0x1f4   : > { %v3747_v13 = vadd.f32 %v3054_v11, %v3633_v9  ;;  %v997_v14 = vpop.f32.mrb[25].mxu1  ;;  %1250 = vrot.lane.b32.xlu1 %v3282_v6, %s3451_s19 }
 0x1f5   : > { %v3284_v16 = vpop.eup %3283  ;;  %3293 = vpow2.f32 %v1166_v8  ;;  %v3751_v19 = vadd.f32 %v3633_v9, %v997_v14  ;;  %v3055_v20 = vpop.f32.mrb[26].mxu1 }
 0x1f6   : > { %v3754_v21 = vadd.f32 %v3055_v20, %v3633_v9  ;;  %v1000_v24 = vpop.f32.mrb[27].mxu1  ;;  %1252 = vrot.lane.b32.xlu0 %v3284_v16, %s3451_s19  ;;  %3295 = vpow2.f32 %v1168_v7  ;;  %v1118_v26 = vmul.f32 0.5, %v3747_v13 }
 0x1f7   : > { %v3286_v25 = vpop.eup %3285  ;;  %v1116_v30 = vmul.f32 0.5, %v3751_v19  ;;  %v3760_v33 = vadd.f32 %v3633_v9, %v1000_v24  ;;  %3297 = vpow2.f32 %v1170_v17 }
 0x1f8   : > { %1254 = vrot.lane.b32.xlu1 %v3286_v25, %s3451_s19  ;;  %v3288_v34 = vpop.eup %3287  ;;  %v1119_v37 = vmul.f32 0.5, %v3754_v21  ;;  %v1176_v41 = vmul.f32 1.442695, %v1118_v26 }
 0x1f9   : > { %v1172_v36 = vmul.f32 1.442695, %v1116_v30  ;;  %v1117_v39 = vmul.f32 0.5, %v3760_v33  ;;  %v3290_v40 = vpop.eup %3289 }
 0x1fa   : > { %1256 = vrot.lane.b32.xlu0 %v3288_v34, %s3451_s19  ;;  %v1178_v51 = vmul.f32 1.442695, %v1119_v37  ;;  %v3149_v34 = vpack.i.bf16 %v3643_v15, %v3636_v10  ;;  %v3164_v37 = vpack.i.bf16 %v3681_v53, %v3671_v47 }
 0x1fb   : > { %3299 = vpow2.f32 %v1172_v36  ;;  %v1174_v42 = vmul.f32 1.442695, %v1117_v39  ;;  %v3058_v44 = vpop.f32.mrb[28].mxu1  ;;  %v3144_v36 = vpack.i.bf16 %v3647_v18, %v3639_v12  ;;  %v3154_v39 = vpack.i.bf16 %v3663_v35, %v3655_v29 }
 0x1fc   : > { %v3767_v45 = vadd.f32 %v3058_v44, %v3633_v9  ;;  %v1013_v46 = vpop.f32.mrb[29].mxu1  ;;  %1258 = vrot.lane.b32.xlu1 %v3290_v40, %s3451_s19  ;;  %v3174_v40 = vpack.i.bf16 %v3700_v22, %v3691_v2  ;;  %v3169_v44 = vpack.i.bf16 %v3675_v49, %v3668_v43 }
 0x1fd   : > { %v3292_v48 = vpop.eup %3291  ;;  %3301 = vpow2.f32 %v1174_v42  ;;  %v3771_v52 = vadd.f32 %v3633_v9, %v1013_v46  ;;  %v3059_v54 = vpop.f32.mrb[30].mxu1  ;;  %v3184_v42 = vpack.i.bf16 %v3720_v38, %v3711_v28  ;;  %v3247_v46 = vld [vmem:[%s4504_s8] sm:$0xff]  }
 0x1fe   : > { %v3774_v56 = vadd.f32 %v3059_v54, %v3633_v9  ;;  %v1016_v58 = vpop.f32.mrb[31].mxu1  ;;  %1260 = vrot.lane.b32.xlu0 %v3292_v48, %s3451_s19  ;;  %3303 = vpow2.f32 %v1176_v41  ;;  %v1122_v60 = vmul.f32 0.5, %v3767_v45  ;;  %v3159_v41 = vpack.i.bf16 %v3658_v31, %v3652_v27  ;;  %v3248_v48 = vld [vmem:[%s4504_s8 + $0x8] sm:$0xff]   ;;  %3094 = vmatprep.subr.bf16.mxu1 %v3247_v46 }
 0x1ff   : > { %v3294_v59 = vpop.eup %3293  ;;  %v1120_v61 = vmul.f32 0.5, %v3771_v52  ;;  %v3780_v0 = vadd.f32 %v3633_v9, %v1016_v58  ;;  %3305 = vpow2.f32 %v1178_v51  ;;  %v3194_v51 = vpack.i.bf16 %v3740_v63, %v3731_v55  ;;  %3095 = vmatpush3.bf16.msra.mxu1 %v3247_v46  ;;  %v3249_v58 = vld [vmem:[%s4504_s8 + $0x10] sm:$0xff]  }
 0x200   : > { %1262 = vrot.lane.b32.xlu1 %v3294_v59, %s3451_s19  ;;  %v3296_v1 = vpop.eup %3295  ;;  %v1123_v5 = vmul.f32 0.5, %v3774_v56  ;;  %v1184_v8 = vmul.f32 1.442695, %v1122_v60  ;;  %v3179_v54 = vpack.i.bf16 %v3694_v4, %v3688_v62  ;;  %3096 = vmatprep.subr.bf16.mxu1 %v3248_v48  ;;  %v3189_v59 = vpack.i.bf16 %v3714_v32, %v3707_v23  ;;  %v3250_v60 = vld [vmem:[%s4504_s8 + $0x18] sm:$0xff]  }
 0x201   : > { %v1180_v3 = vmul.f32 1.442695, %v1120_v61  ;;  %v1121_v6 = vmul.f32 0.5, %v3780_v0  ;;  %v3298_v7 = vpop.eup %3297  ;;  %v3199_v61 = vpack.i.bf16 %v3734_v57, %v3727_v50 }
 0x202   : > { %1264 = vrot.lane.b32.xlu0 %v3296_v1, %s3451_s19  ;;  %v1186_v9 = vmul.f32 1.442695, %v1123_v5  ;;  %v2831_v1 = vld [vmem:[%s3847_s12] sm:$0xff]  }
 0x203   : > { %3307 = vpow2.f32 %v1180_v3  ;;  %v1182_v11 = vmul.f32 1.442695, %v1121_v6  ;;  %3097 = vmatpush3.bf16.msra.mxu1 %v3248_v48  ;;  %v2894_v3 = vld [vmem:[%s3847_s12 + $0x8] sm:$0xff]   ;;  %v2832_v6 = vunpack.c.l.bf16 %v2831_v1 }
 0x204   : > { %1266 = vrot.lane.b32.xlu1 %v3298_v7, %s3451_s19  ;;  %3098 = vmatprep.subr.bf16.mxu1 %v3249_v58  ;;  %v2836_v7 = vunpack.c.l.bf16 %v2894_v3 }
 0x205   : > { %v3300_v14 = vpop.eup %3299  ;;  %3309 = vpow2.f32 %v1182_v11  ;;  %v2837_v11 = vunpack.c.h.bf16 %v2894_v3  ;;  %v2898_v3 = vld [vmem:[%s3847_s12 + $0x28] sm:$0xff]  }
 0x206   : > { %1268 = vrot.lane.b32.xlu0 %v3300_v14, %s3451_s19  ;;  %3311 = vpow2.f32 %v1184_v8  ;;  %v2833_v14 = vunpack.c.h.bf16 %v2831_v1 }
 0x207   : > { %v3302_v16 = vpop.eup %3301  ;;  %3313 = vpow2.f32 %v1186_v9  ;;  %3099 = vmatpush3.bf16.msra.mxu1 %v3249_v58  ;;  %v2895_v9 = vld [vmem:[%s3847_s12 + $0x10] sm:$0xff]   ;;  %v2897_v58 = vld [vmem:[%s3847_s12 + $0x20] sm:$0xff]  }
 0x208   : > { %1270 = vrot.lane.b32.xlu1 %v3302_v16, %s3451_s19  ;;  %v3304_v17 = vpop.eup %3303  ;;  %3100 = vmatprep.subr.bf16.mxu1 %v3250_v60 }
 0x209   : > { %v3306_v20 = vpop.eup %3305 }
 0x20a   : > { %1272 = vrot.lane.b32.xlu0 %v3304_v17, %s3451_s19 }
 0x20b   : > { %3101 = vmatpush3.bf16.msra.mxu1 %v3250_v60 }
 0x20c   : > { %1274 = vrot.lane.b32.xlu1 %v3306_v20, %s3451_s19 }
 0x20d   : > { %v3308_v24 = vpop.eup %3307 }
 0x20e   : > { %1276 = vrot.lane.b32.xlu0 %v3308_v24, %s3451_s19 }
 0x20f   : > { %v3310_v25 = vpop.eup %3309 }
 0x210   : > { %1278 = vrot.lane.b32.xlu1 %v3310_v25, %s3451_s19  ;;  %v3312_v26 = vpop.eup %3311 }
 0x211   : > { %v3314_v30 = vpop.eup %3313 }
 0x212   : > { %1280 = vrot.lane.b32.xlu0 %v3312_v26, %s3451_s19 }
 0x214   : > { %1282 = vrot.lane.b32.xlu1 %v3314_v30, %s3451_s19  ;;  %v2840_v30 = vunpack.c.l.bf16 %v2895_v9 }
 0x216   : > { %3150 = vrot.lane.b32.xlu0 %v3149_v34, %s3452_s20 }
 0x218   : > { %3145 = vrot.lane.b32.xlu1 %v3144_v36, %s3452_s20  ;;  %v2896_v36 = vld [vmem:[%s3847_s12 + $0x18] sm:$0xff]  }
 0x219   : > { %v2844_v48 = vunpack.c.l.bf16 %v2896_v36 }
 0x21a   : > { %3165 = vrot.lane.b32.xlu0 %v3164_v37, %s3452_s20 }
 0x21c   : > { %3155 = vrot.lane.b32.xlu1 %v3154_v39, %s3452_s20 }
 0x21e   : > { %3175 = vrot.lane.b32.xlu0 %v3174_v40, %s3452_s20  ;;  %v2841_v40 = vunpack.c.h.bf16 %v2895_v9 }
 0x220   : > { %3160 = vrot.lane.b32.xlu1 %v3159_v41, %s3452_s20 }
 0x222   : > { %3185 = vrot.lane.b32.xlu0 %v3184_v42, %s3452_s20 }
 0x224   : > { %3170 = vrot.lane.b32.xlu1 %v3169_v44, %s3452_s20 }
 0x226   : > { %3195 = vrot.lane.b32.xlu0 %v3194_v51, %s3452_s20 }
 0x228   : > { %3180 = vrot.lane.b32.xlu1 %v3179_v54, %s3452_s20 }
 0x22c   : > { %3190 = vrot.lane.b32.xlu1 %v3189_v59, %s3452_s20 }
 0x230   : > { %3200 = vrot.lane.b32.xlu1 %v3199_v61, %s3452_s20  ;;  %v2848_v61 = vunpack.c.l.bf16 %v2897_v58 }
 0x247   : > { %v1225_v5 = vpop.permute.xlu1 %1224 }
 0x248   : > { %v1221_v8 = vpop.permute.xlu0 %1220  ;;  %v1318_v20 = vmul.f32 %v2836_v7, %v1225_v5  ;;  %v2849_v7 = vunpack.c.h.bf16 %v2897_v58 }
 0x249   : > { %v1316_v16 = vmul.f32 %v2832_v6, %v1221_v8 }
 0x24a   : > { %v1350_v41 = vadd.f32 %v1318_v20, %v3636_v10 }
 0x24b   : > { %v1227_v17 = vpop.permute.xlu1 %1226  ;;  %v1348_v37 = vadd.f32 %v1316_v16, %v3639_v12 }
 0x24c   : > { %v1319_v24 = vmul.f32 %v2837_v11, %v1227_v17  ;;  %v1223_v25 = vpop.permute.xlu0 %1222  ;;  %v2899_v17 = vld [vmem:[%s3847_s12 + $0x30] sm:$0xff]  }
 0x24d   : > { %v1317_v26 = vmul.f32 %v2833_v14, %v1223_v25 }
 0x24e   : > { %v1351_v34 = vadd.f32 %v1319_v24, %v3643_v15  ;;  %v2845_v15 = vunpack.c.h.bf16 %v2896_v36  ;;  %v2853_v24 = vunpack.c.h.bf16 %v2898_v3  ;;  %v2900_v36 = vld [vmem:[%s3847_s12 + $0x38] sm:$0xff]  }
 0x24f   : > { %v1349_v39 = vadd.f32 %v1317_v26, %v3647_v18  ;;  %v2861_v58 = vunpack.c.h.bf16 %v2900_v36 }
 0x250   : > { %v1229_v42 = vpop.permute.xlu0 %1228  ;;  %v1381_v51 = vpack.c.bf16 %v1351_v34, %v1350_v41 }
 0x251   : > { %v1380_v44 = vpack.c.bf16 %v1349_v39, %v1348_v37  ;;  %v1320_v46 = vmul.f32 %v2840_v30, %v1229_v42 }
 0x252   : > { %v1231_v54 = vpop.permute.xlu1 %1230 }
 0x253   : > { %v1321_v59 = vmul.f32 %v2841_v40, %v1231_v54  ;;  %3062 = vmatprep.mubr.msk.bf16.mxu0 %vm1411_vm2, %v1380_v44  ;;  %v1352_v18 = vadd.f32 %v1320_v46, %v3655_v29  ;;  %v2852_v29 = vunpack.c.l.bf16 %v2898_v3  ;;  %v2857_v40 = vunpack.c.h.bf16 %v2899_v17 }
 0x254   : > { %3063 = vmatmul.mubr.msk.bf16.vlgmr.msra.gmra.mrb[32].mxu0 %vm1411_vm2, %v1381_v51  ;;  %v1233_v12 = vpop.permute.xlu0 %1232 }
 0x255   : > { %v1353_v10 = vadd.f32 %v1321_v59, %v3663_v35  ;;  %v1322_v60 = vmul.f32 %v2844_v48, %v1233_v12  ;;  %v2901_v48 = vld [vmem:[%s3847_s12 + $0x40] sm:$0xff]  }
 0x256   : > { %v1235_v1 = vpop.permute.xlu1 %1234 }
 0x257   : > { %v1382_v5 = vpack.c.bf16 %v1353_v10, %v1352_v18  ;;  %v1323_v6 = vmul.f32 %v2845_v15, %v1235_v1  ;;  %v1354_v11 = vadd.f32 %v1322_v60, %v3652_v27  ;;  %v2856_v27 = vunpack.c.l.bf16 %v2899_v17  ;;  %v2902_v10 = vld [vmem:[%s3847_s12 + $0x48] sm:$0xff]  }
 0x258   : > { %v1237_v8 = vpop.permute.xlu0 %1236  ;;  %v2865_v1 = vunpack.c.h.bf16 %v2901_v48 }
 0x259   : > { %v1355_v14 = vadd.f32 %v1323_v6, %v3658_v31  ;;  %v1324_v9 = vmul.f32 %v2848_v61, %v1237_v8  ;;  %3066 = vmatprep.mubr.msk.bf16.mxu0 %vm1411_vm2, %v1382_v5  ;;  %v2903_v8 = vld [vmem:[%s3847_s12 + $0x50] sm:$0xff]  }
 0x25a   : > { %v1239_v16 = vpop.permute.xlu1 %1238 }
 0x25b   : > { %v1383_v35 = vpack.c.bf16 %v1355_v14, %v1354_v11  ;;  %v1325_v20 = vmul.f32 %v2849_v7, %v1239_v16  ;;  %v1356_v26 = vadd.f32 %v1324_v9, %v3671_v47  ;;  %v2860_v47 = vunpack.c.l.bf16 %v2900_v36  ;;  %v2905_v36 = vld [vmem:[%s3847_s12 + $0x60] sm:$0xff]  }
 0x25c   : > { %v1241_v25 = vpop.permute.xlu0 %1240  ;;  %v2869_v9 = vunpack.c.h.bf16 %v2902_v10 }
 0x25d   : > { %v1357_v30 = vadd.f32 %v1325_v20, %v3681_v53  ;;  %v1326_v34 = vmul.f32 %v2852_v29, %v1241_v25  ;;  %3067 = vmatmul.mubr.msk.bf16.gmra.mrb[36].mxu0 %vm1411_vm2, %v1383_v35  ;;  %v2904_v20 = vld [vmem:[%s3847_s12 + $0x58] sm:$0xff]  }
 0x25e   : > { %v1243_v31 = vpop.permute.xlu1 %1242 }
 0x25f   : > { %v1384_v37 = vpack.c.bf16 %v1357_v30, %v1356_v26  ;;  %v1327_v39 = vmul.f32 %v2853_v24, %v1243_v31  ;;  %v1358_v42 = vadd.f32 %v1326_v34, %v3668_v43  ;;  %v2864_v43 = vunpack.c.l.bf16 %v2901_v48 }
 0x260   : > { %v1245_v41 = vpop.permute.xlu0 %1244  ;;  %v2873_v26 = vunpack.c.h.bf16 %v2903_v8 }
 0x261   : > { %v1359_v44 = vadd.f32 %v1327_v39, %v3675_v49  ;;  %v1328_v46 = vmul.f32 %v2856_v27, %v1245_v41  ;;  %3070 = vmatprep.mubr.msk.bf16.mxu0 %vm1411_vm2, %v1384_v37 }
 0x262   : > { %v1247_v53 = vpop.permute.xlu1 %1246 }
 0x263   : > { %v1385_v51 = vpack.c.bf16 %v1359_v44, %v1358_v42  ;;  %v1329_v54 = vmul.f32 %v2857_v40, %v1247_v53  ;;  %v1360_v15 = vadd.f32 %v1328_v46, %v3691_v2  ;;  %v2868_v2 = vunpack.c.l.bf16 %v2902_v10 }
 0x264   : > { %v1249_v59 = vpop.permute.xlu0 %1248  ;;  %v2877_v40 = vunpack.c.h.bf16 %v2904_v20 }
 0x265   : > { %v1361_v12 = vadd.f32 %v1329_v54, %v3700_v22  ;;  %v1330_v18 = vmul.f32 %v2860_v47, %v1249_v59  ;;  %3071 = vmatmul.mubr.msk.bf16.gmra.mrb[40].mxu0 %vm1411_vm2, %v1385_v51  ;;  %v2906_v47 = vld [vmem:[%s3847_s12 + $0x68] sm:$0xff]   ;;  %v2881_v51 = vunpack.c.h.bf16 %v2905_v36 }
 0x266   : > { %v1251_v49 = vpop.permute.xlu1 %1250 }
 0x267   : > { %v1386_v60 = vpack.c.bf16 %v1361_v12, %v1360_v15  ;;  %v1331_v61 = vmul.f32 %v2861_v58, %v1251_v49  ;;  %v1362_v5 = vadd.f32 %v1330_v18, %v3688_v62  ;;  %v2872_v62 = vunpack.c.l.bf16 %v2903_v8  ;;  %v2907_v12 = vld [vmem:[%s3847_s12 + $0x70] sm:$0xff]  }
 0x268   : > { %v1253_v3 = vpop.permute.xlu0 %1252  ;;  %v2885_v49 = vunpack.c.h.bf16 %v2906_v47 }
 0x269   : > { %v1363_v6 = vadd.f32 %v1331_v61, %v3694_v4  ;;  %v1332_v7 = vmul.f32 %v2864_v43, %v1253_v3  ;;  %3074 = vmatprep.mubr.msk.bf16.mxu0 %vm1411_vm2, %v1386_v60  ;;  %v2908_v3 = vld [vmem:[%s3847_s12 + $0x78] sm:$0xff]  }
 0x26a   : > { %v1255_v22 = vpop.permute.xlu1 %1254 }
 0x26b   : > { %v1387_v11 = vpack.c.bf16 %v1363_v6, %v1362_v5  ;;  %v1333_v14 = vmul.f32 %v2865_v1, %v1255_v22  ;;  %v1364_v16 = vadd.f32 %v1332_v7, %v3711_v28  ;;  %v2876_v28 = vunpack.c.l.bf16 %v2904_v20 }
 0x26c   : > { %v1257_v29 = vpop.permute.xlu0 %1256  ;;  %v2889_v7 = vunpack.c.h.bf16 %v2907_v12 }
 0x26d   : > { %v1365_v17 = vadd.f32 %v1333_v14, %v3720_v38  ;;  %v1334_v35 = vmul.f32 %v2868_v2, %v1257_v29  ;;  %3075 = vmatmul.mubr.msk.bf16.gmra.mrb[44].mxu0 %vm1411_vm2, %v1387_v11  ;;  %v2892_v14 = vunpack.c.l.bf16 %v2908_v3 }
 0x26e   : > { %v1259_v4 = vpop.permute.xlu1 %1258 }
 0x26f   : > { %v1388_v24 = vpack.c.bf16 %v1365_v17, %v1364_v16  ;;  %v1335_v25 = vmul.f32 %v2869_v9, %v1259_v4  ;;  %v1366_v34 = vadd.f32 %v1334_v35, %v3707_v23  ;;  %v2880_v23 = vunpack.c.l.bf16 %v2905_v36 }
 0x270   : > { %v1261_v30 = vpop.permute.xlu0 %1260  ;;  %v2893_v17 = vunpack.c.h.bf16 %v2908_v3 }
 0x271   : > { %v1367_v27 = vadd.f32 %v1335_v25, %v3714_v32  ;;  %v1336_v31 = vmul.f32 %v2872_v62, %v1261_v30  ;;  %3078 = vmatprep.mubr.msk.bf16.mxu0 %vm1411_vm2, %v1388_v24 }
 0x272   : > { %v1263_v38 = vpop.permute.xlu1 %1262 }
 0x273   : > { %v1389_v37 = vpack.c.bf16 %v1367_v27, %v1366_v34  ;;  %v1337_v39 = vmul.f32 %v2873_v26, %v1263_v38  ;;  %v1368_v42 = vadd.f32 %v1336_v31, %v3731_v55  ;;  %v2884_v55 = vunpack.c.l.bf16 %v2906_v47  ;;  %v3916_v31 = vld [vmem:[%s4503_s7] ss:$0 sm:$0xff] }
 0x274   : > { %v1265_v41 = vpop.permute.xlu0 %1264 }
 0x275   : > { %v1369_v44 = vadd.f32 %v1337_v39, %v3740_v63  ;;  %v1338_v46 = vmul.f32 %v2876_v28, %v1265_v41  ;;  %3079 = vmatmul.mubr.msk.bf16.gmra.mrb[48].mxu0 %vm1411_vm2, %v1389_v37 }
 0x276   : > { %v1267_v32 = vpop.permute.xlu1 %1266 }
 0x277   : > { %v1390_v53 = vpack.c.bf16 %v1369_v44, %v1368_v42  ;;  %v1339_v48 = vmul.f32 %v2877_v40, %v1267_v32  ;;  %v1370_v58 = vadd.f32 %v1338_v46, %v3727_v50  ;;  %v2888_v50 = vunpack.c.l.bf16 %v2907_v12 }
 0x278   : > { %v1269_v54 = vpop.permute.xlu0 %1268 }
 0x279   : > { %v1371_v59 = vadd.f32 %v1339_v48, %v3734_v57  ;;  %v1340_v15 = vmul.f32 %v2880_v23, %v1269_v54  ;;  %3082 = vmatprep.mubr.msk.bf16.mxu0 %vm1411_vm2, %v1390_v53 }
 0x27a   : > { %v1271_v63 = vpop.permute.xlu1 %1270 }
 0x27b   : > { %v1391_v18 = vpack.c.bf16 %v1371_v59, %v1370_v58  ;;  %v1341_v43 = vmul.f32 %v2881_v51, %v1271_v63  ;;  %v1372_v60 = vadd.f32 %v1340_v15, %v3751_v19 }
 0x27c   : > { %v1273_v10 = vpop.permute.xlu0 %1272 }
 0x27d   : > { %v1373_v61 = vadd.f32 %v1341_v43, %v3760_v33  ;;  %v1342_v1 = vmul.f32 %v2884_v55, %v1273_v10  ;;  %3083 = vmatmul.mubr.msk.bf16.gmra.mrb[52].mxu0 %vm1411_vm2, %v1391_v18 }
 0x27e   : > { %v1275_v57 = vpop.permute.xlu1 %1274 }
 0x27f   : > { %v1392_v5 = vpack.c.bf16 %v1373_v61, %v1372_v60  ;;  %v1343_v6 = vmul.f32 %v2885_v49, %v1275_v57  ;;  %v1374_v22 = vadd.f32 %v1342_v1, %v3747_v13 }
 0x280   : > { %v1277_v2 = vpop.permute.xlu0 %1276 }
 0x281   : > { %v1375_v8 = vadd.f32 %v1343_v6, %v3754_v21  ;;  %v1344_v11 = vmul.f32 %v2888_v50, %v1277_v2  ;;  %3086 = vmatprep.mubr.msk.bf16.mxu0 %vm1411_vm2, %v1392_v5 }
 0x282   : > { %v1279_v9 = vpop.permute.xlu1 %1278 }
 0x283   : > { %v1393_v29 = vpack.c.bf16 %v1375_v8, %v1374_v22  ;;  %v1345_v16 = vmul.f32 %v2889_v7, %v1279_v9  ;;  %v1376_v62 = vadd.f32 %v1344_v11, %v3771_v52 }
 0x284   : > { %v1281_v35 = vpop.permute.xlu0 %1280 }
 0x285   : > { %v1377_v4 = vadd.f32 %v1345_v16, %v3780_v0  ;;  %v1346_v20 = vmul.f32 %v2892_v14, %v1281_v35  ;;  %3087 = vmatmul.mubr.msk.bf16.gmra.mrb[56].mxu0 %vm1411_vm2, %v1393_v29 }
 0x286   : > { %v1283_v24 = vpop.permute.xlu1 %1282 }
 0x287   : > { %v1394_v25 = vpack.c.bf16 %v1377_v4, %v1376_v62  ;;  %v1347_v26 = vmul.f32 %v2893_v17, %v1283_v24  ;;  %v1378_v30 = vadd.f32 %v1346_v20, %v3767_v45 }
 0x289   : > { %v1379_v34 = vadd.f32 %v1347_v26, %v3774_v56  ;;  %3090 = vmatprep.mubr.msk.bf16.mxu0 %vm1411_vm2, %v1394_v25 }
 0x28b   : > { %v1395_v27 = vpack.c.bf16 %v1379_v34, %v1378_v30 }
 0x28d   : > { %3091 = vmatmul.mubr.msk.bf16.gmra.mrb[60].mxu0 %vm1411_vm2, %v1395_v27 }
 0x327   : > { %v3064_v28 = vpop.f32.mrb[32].mxu0 }
 0x328   : > { %v1503_v38 = vadd.f32 %v3064_v28, %v3916_v31  ;;  %v1494_v36 = vpop.f32.mrb[33].mxu0 }
 0x329   : > { %v1495_v37 = vadd.f32 %v3916_v31, %v1494_v36  ;;  %v3065_v39 = vpop.f32.mrb[34].mxu0 }
 0x32a   : > { %v1506_v40 = vadd.f32 %v3065_v39, %v3916_v31  ;;  %v1497_v41 = vpop.f32.mrb[35].mxu0  ;;  %v1623_v44 = vmax.f32 %v1503_v38, 0.0 }
 0x32b   : > { %v1498_v42 = vadd.f32 %v3916_v31, %v1497_v41  ;;  %v1621_v23 = vmax.f32 %v1495_v37, 0.0 }
 0x32c   : > { %v1624_v46 = vmax.f32 %v1506_v40, 0.0 }
 0x32d   : > { %v1622_v32 = vmax.f32 %v1498_v42, 0.0 }
 0x32e   : > { %v1654_v47 = vpack.c.bf16 %v1624_v46, %v1623_v44 }
 0x32f   : > { %v1653_v53 = vpack.c.bf16 %v1622_v32, %v1621_v23 }
 0x330   : > { %v3068_v48 = vpop.f32.mrb[36].mxu0 }
 0x331   : > { %v1519_v51 = vadd.f32 %v3068_v48, %v3916_v31  ;;  %v1510_v54 = vpop.f32.mrb[37].mxu0  ;;  %3102 = vmatprep.mubr.msk.bf16.mxu1 %vm818_vm1, %v1653_v53 }
 0x332   : > { %v1511_v58 = vadd.f32 %v3916_v31, %v1510_v54  ;;  %v3069_v59 = vpop.f32.mrb[38].mxu0  ;;  %3103 = vmatmul.mubr.msk.bf16.vlgmr.msra.gmra.mrb[32].mxu1 %vm818_vm1, %v1654_v47 }
 0x333   : > { %v1522_v15 = vadd.f32 %v3069_v59, %v3916_v31  ;;  %v1513_v55 = vpop.f32.mrb[39].mxu0  ;;  %v1627_v12 = vmax.f32 %v1519_v51, 0.0 }
 0x334   : > { %v1514_v63 = vadd.f32 %v3916_v31, %v1513_v55  ;;  %v1625_v43 = vmax.f32 %v1511_v58, 0.0 }
 0x335   : > { %v1628_v18 = vmax.f32 %v1522_v15, 0.0 }
 0x336   : > { %v1626_v49 = vmax.f32 %v1514_v63, 0.0 }
 0x337   : > { %v1656_v10 = vpack.c.bf16 %v1628_v18, %v1627_v12 }
 0x338   : > { %v1655_v60 = vpack.c.bf16 %v1626_v49, %v1625_v43  ;;  %v3072_v61 = vpop.f32.mrb[40].mxu0 }
 0x339   : > { %v1535_v1 = vadd.f32 %v3072_v61, %v3916_v31  ;;  %v1526_v50 = vpop.f32.mrb[41].mxu0 }
 0x33a   : > { %v1527_v57 = vadd.f32 %v3916_v31, %v1526_v50  ;;  %v3073_v3 = vpop.f32.mrb[42].mxu0  ;;  %3106 = vmatprep.mubr.msk.bf16.mxu1 %vm818_vm1, %v1655_v60 }
 0x33b   : > { %v1538_v5 = vadd.f32 %v3073_v3, %v3916_v31  ;;  %v1529_v6 = vpop.f32.mrb[43].mxu0  ;;  %3107 = vmatmul.mubr.msk.bf16.gmra.mrb[36].mxu1 %vm818_vm1, %v1656_v10  ;;  %v1631_v2 = vmax.f32 %v1535_v1, 0.0 }
 0x33c   : > { %v1530_v7 = vadd.f32 %v3916_v31, %v1529_v6  ;;  %v1629_v8 = vmax.f32 %v1527_v57, 0.0 }
 0x33d   : > { %v1632_v22 = vmax.f32 %v1538_v5, 0.0 }
 0x33e   : > { %v1630_v11 = vmax.f32 %v1530_v7, 0.0 }
 0x33f   : > { %v1658_v14 = vpack.c.bf16 %v1632_v22, %v1631_v2 }
 0x340   : > { %v1657_v9 = vpack.c.bf16 %v1630_v11, %v1629_v8  ;;  %v3076_v29 = vpop.f32.mrb[44].mxu0 }
 0x341   : > { %v1551_v16 = vadd.f32 %v3076_v29, %v3916_v31  ;;  %v1542_v17 = vpop.f32.mrb[45].mxu0 }
 0x342   : > { %v1543_v35 = vadd.f32 %v3916_v31, %v1542_v17  ;;  %v3077_v62 = vpop.f32.mrb[46].mxu0  ;;  %3110 = vmatprep.mubr.msk.bf16.mxu1 %vm818_vm1, %v1657_v9 }
 0x343   : > { %v1554_v4 = vadd.f32 %v3077_v62, %v3916_v31  ;;  %v1545_v20 = vpop.f32.mrb[47].mxu0  ;;  %3111 = vmatmul.mubr.msk.bf16.gmra.mrb[40].mxu1 %vm818_vm1, %v1658_v14  ;;  %v1635_v25 = vmax.f32 %v1551_v16, 0.0 }
 0x344   : > { %v1546_v24 = vadd.f32 %v3916_v31, %v1545_v20  ;;  %v1633_v30 = vmax.f32 %v1543_v35, 0.0 }
 0x345   : > { %v1636_v26 = vmax.f32 %v1554_v4, 0.0 }
 0x346   : > { %v1634_v34 = vmax.f32 %v1546_v24, 0.0 }
 0x347   : > { %v1660_v27 = vpack.c.bf16 %v1636_v26, %v1635_v25 }
 0x348   : > { %v1659_v28 = vpack.c.bf16 %v1634_v34, %v1633_v30  ;;  %v3080_v38 = vpop.f32.mrb[48].mxu0 }
 0x349   : > { %v1567_v36 = vadd.f32 %v3080_v38, %v3916_v31  ;;  %v1558_v37 = vpop.f32.mrb[49].mxu0 }
 0x34a   : > { %v1559_v39 = vadd.f32 %v3916_v31, %v1558_v37  ;;  %v3081_v40 = vpop.f32.mrb[50].mxu0  ;;  %3114 = vmatprep.mubr.msk.bf16.mxu1 %vm818_vm1, %v1659_v28 }
 0x34b   : > { %v1570_v41 = vadd.f32 %v3081_v40, %v3916_v31  ;;  %v1561_v42 = vpop.f32.mrb[51].mxu0  ;;  %3115 = vmatmul.mubr.msk.bf16.gmra.mrb[44].mxu1 %vm818_vm1, %v1660_v27  ;;  %v1639_v46 = vmax.f32 %v1567_v36, 0.0  ;;  %v3969_v36 = vld [vmem:[%s4505_s9] ss:$0 sm:$0xff] }
 0x34c   : > { %v1562_v44 = vadd.f32 %v3916_v31, %v1561_v42  ;;  %v1637_v32 = vmax.f32 %v1559_v39, 0.0 }
 0x34d   : > { %v1640_v23 = vmax.f32 %v1570_v41, 0.0 }
 0x34e   : > { %v1638_v47 = vmax.f32 %v1562_v44, 0.0 }
 0x34f   : > { %v1662_v53 = vpack.c.bf16 %v1640_v23, %v1639_v46 }
 0x350   : > { %v1661_v48 = vpack.c.bf16 %v1638_v47, %v1637_v32  ;;  %v3084_v51 = vpop.f32.mrb[52].mxu0 }
 0x351   : > { %v1583_v54 = vadd.f32 %v3084_v51, %v3916_v31  ;;  %v1574_v58 = vpop.f32.mrb[53].mxu0 }
 0x352   : > { %v1575_v59 = vadd.f32 %v3916_v31, %v1574_v58  ;;  %v3085_v15 = vpop.f32.mrb[54].mxu0  ;;  %3118 = vmatprep.mubr.msk.bf16.mxu1 %vm818_vm1, %v1661_v48 }
 0x353   : > { %v1586_v55 = vadd.f32 %v3085_v15, %v3916_v31  ;;  %v1577_v63 = vpop.f32.mrb[55].mxu0  ;;  %3119 = vmatmul.mubr.msk.bf16.gmra.mrb[48].mxu1 %vm818_vm1, %v1662_v53  ;;  %v1643_v18 = vmax.f32 %v1583_v54, 0.0 }
 0x354   : > { %v1578_v12 = vadd.f32 %v3916_v31, %v1577_v63  ;;  %v1641_v49 = vmax.f32 %v1575_v59, 0.0 }
 0x355   : > { %v1644_v43 = vmax.f32 %v1586_v55, 0.0 }
 0x356   : > { %v1642_v10 = vmax.f32 %v1578_v12, 0.0 }
 0x357   : > { %v1664_v60 = vpack.c.bf16 %v1644_v43, %v1643_v18 }
 0x358   : > { %v1663_v61 = vpack.c.bf16 %v1642_v10, %v1641_v49  ;;  %v3088_v1 = vpop.f32.mrb[56].mxu0 }
 0x359   : > { %v1599_v50 = vadd.f32 %v3088_v1, %v3916_v31  ;;  %v1590_v57 = vpop.f32.mrb[57].mxu0 }
 0x35a   : > { %v1591_v3 = vadd.f32 %v3916_v31, %v1590_v57  ;;  %v3089_v5 = vpop.f32.mrb[58].mxu0  ;;  %3122 = vmatprep.mubr.msk.bf16.mxu1 %vm818_vm1, %v1663_v61 }
 0x35b   : > { %v1602_v6 = vadd.f32 %v3089_v5, %v3916_v31  ;;  %v1593_v7 = vpop.f32.mrb[59].mxu0  ;;  %3123 = vmatmul.mubr.msk.bf16.gmra.mrb[52].mxu1 %vm818_vm1, %v1664_v60  ;;  %v1647_v22 = vmax.f32 %v1599_v50, 0.0 }
 0x35c   : > { %v1594_v2 = vadd.f32 %v3916_v31, %v1593_v7  ;;  %v1645_v11 = vmax.f32 %v1591_v3, 0.0 }
 0x35d   : > { %v1648_v8 = vmax.f32 %v1602_v6, 0.0 }
 0x35e   : > { %v1646_v14 = vmax.f32 %v1594_v2, 0.0 }
 0x35f   : > { %v1666_v9 = vpack.c.bf16 %v1648_v8, %v1647_v22 }
 0x360   : > { %v1665_v29 = vpack.c.bf16 %v1646_v14, %v1645_v11  ;;  %v3092_v16 = vpop.f32.mrb[60].mxu0 }
 0x361   : > { %v1615_v17 = vadd.f32 %v3092_v16, %v3916_v31  ;;  %v1606_v35 = vpop.f32.mrb[61].mxu0 }
 0x362   : > { %v1607_v62 = vadd.f32 %v3916_v31, %v1606_v35  ;;  %v3093_v4 = vpop.f32.mrb[62].mxu0  ;;  %3126 = vmatprep.mubr.msk.bf16.mxu1 %vm818_vm1, %v1665_v29 }
 0x363   : > { %v1618_v20 = vadd.f32 %v3093_v4, %v3916_v31  ;;  %v1609_v24 = vpop.f32.mrb[63].mxu0  ;;  %3127 = vmatmul.mubr.msk.bf16.gmra.mrb[56].mxu1 %vm818_vm1, %v1666_v9  ;;  %v1651_v26 = vmax.f32 %v1615_v17, 0.0 }
 0x364   : > { %v1610_v25 = vadd.f32 %v3916_v31, %v1609_v24  ;;  %v1649_v34 = vmax.f32 %v1607_v62, 0.0 }
 0x365   : > { %v1652_v30 = vmax.f32 %v1618_v20, 0.0 }
 0x366   : > { %v1650_v27 = vmax.f32 %v1610_v25, 0.0 }
 0x367   : > { %v1668_v28 = vpack.c.bf16 %v1652_v30, %v1651_v26 }
 0x368   : > { %v1667_v38 = vpack.c.bf16 %v1650_v27, %v1649_v34 }
 0x36a   : > { %3130 = vmatprep.mubr.msk.bf16.mxu1 %vm818_vm1, %v1667_v38 }
 0x36b   : > { %3131 = vmatmul.mubr.msk.bf16.gmra.mrb[60].mxu1 %vm818_vm1, %v1668_v28 }
 0x405   : > { %v3104_v37 = vpop.f32.mrb[32].mxu1 }
 0x406   : > { %v3972_v39 = vadd.f32 %v3104_v37, %v3969_v36  ;;  %v1790_v31 = vpop.f32.mrb[33].mxu1 }
 0x407   : > { %v3105_v40 = vpop.f32.mrb[34].mxu1  ;;  %v3975_v41 = vadd.f32 %v3969_v36, %v1790_v31 }
 0x408   : > { %v1793_v42 = vpop.f32.mrb[35].mxu1  ;;  %v1923_v44 = vsel %vm521_vm0, %v3972_v39, -inf  ;;  %v3985_v32 = vadd.f32 %v3105_v40, %v3969_v36 }
 0x409   : > { %v3980_v46 = vadd.f32 %v3969_v36, %v1793_v42  ;;  %1924 = vmax.xlane.f32.xlu0 %v1923_v44  ;;  %v1917_v47 = vsel %vm521_vm0, %v3975_v41, -inf }
 0x40a   : > { %v1926_v58 = vsel %vm521_vm0, %v3985_v32, -inf }
 0x40b   : > { %v1920_v23 = vsel %vm521_vm0, %v3980_v46, -inf }
 0x40c   : > { %1921 = vmax.xlane.f32.xlu1 %v1920_v23 }
 0x40d   : > { %1918 = vmax.xlane.f32.xlu0 %v1917_v47 }
 0x40e   : > { %v3108_v53 = vpop.f32.mrb[36].mxu1 }
 0x40f   : > { %v3990_v48 = vadd.f32 %v3108_v53, %v3969_v36  ;;  %v1806_v51 = vpop.f32.mrb[37].mxu1 }
 0x410   : > { %v3109_v54 = vpop.f32.mrb[38].mxu1  ;;  %v3995_v59 = vadd.f32 %v3969_v36, %v1806_v51 }
 0x411   : > { %v3998_v15 = vadd.f32 %v3109_v54, %v3969_v36  ;;  %1927 = vmax.xlane.f32.xlu0 %v1926_v58  ;;  %v1809_v55 = vpop.f32.mrb[39].mxu1  ;;  %v1935_v63 = vsel %vm521_vm0, %v3990_v48, -inf }
 0x412   : > { %1936 = vmax.xlane.f32.xlu1 %v1935_v63  ;;  %v4005_v18 = vadd.f32 %v3969_v36, %v1809_v55  ;;  %v1929_v43 = vsel %vm521_vm0, %v3995_v59, -inf }
 0x413   : > { %v1938_v12 = vsel %vm521_vm0, %v3998_v15, -inf }
 0x414   : > { %v1932_v1 = vsel %vm521_vm0, %v4005_v18, -inf }
 0x415   : > { %1939 = vmax.xlane.f32.xlu0 %v1938_v12 }
 0x416   : > { %1930 = vmax.xlane.f32.xlu1 %v1929_v43  ;;  %v3112_v49 = vpop.f32.mrb[40].mxu1 }
 0x417   : > { %v4010_v10 = vadd.f32 %v3112_v49, %v3969_v36  ;;  %v1822_v60 = vpop.f32.mrb[41].mxu1 }
 0x418   : > { %v3113_v61 = vpop.f32.mrb[42].mxu1  ;;  %v4015_v50 = vadd.f32 %v3969_v36, %v1822_v60 }
 0x419   : > { %v4018_v57 = vadd.f32 %v3113_v61, %v3969_v36  ;;  %1933 = vmax.xlane.f32.xlu0 %v1932_v1  ;;  %v1825_v3 = vpop.f32.mrb[43].mxu1  ;;  %v1947_v5 = vsel %vm521_vm0, %v4010_v10, -inf }
 0x41a   : > { %1948 = vmax.xlane.f32.xlu1 %v1947_v5  ;;  %v4025_v7 = vadd.f32 %v3969_v36, %v1825_v3  ;;  %v1941_v2 = vsel %vm521_vm0, %v4015_v50, -inf }
 0x41b   : > { %v1950_v6 = vsel %vm521_vm0, %v4018_v57, -inf }
 0x41c   : > { %v1944_v9 = vsel %vm521_vm0, %v4025_v7, -inf }
 0x41d   : > { %1951 = vmax.xlane.f32.xlu0 %v1950_v6 }
 0x41e   : > { %1942 = vmax.xlane.f32.xlu1 %v1941_v2  ;;  %v3116_v22 = vpop.f32.mrb[44].mxu1 }
 0x41f   : > { %v4030_v8 = vadd.f32 %v3116_v22, %v3969_v36  ;;  %v1838_v11 = vpop.f32.mrb[45].mxu1 }
 0x420   : > { %v3117_v14 = vpop.f32.mrb[46].mxu1  ;;  %v4035_v29 = vadd.f32 %v3969_v36, %v1838_v11 }
 0x421   : > { %v4038_v16 = vadd.f32 %v3117_v14, %v3969_v36  ;;  %1945 = vmax.xlane.f32.xlu0 %v1944_v9  ;;  %v1841_v17 = vpop.f32.mrb[47].mxu1  ;;  %v1959_v35 = vsel %vm521_vm0, %v4030_v8, -inf }
 0x422   : > { %1960 = vmax.xlane.f32.xlu1 %v1959_v35  ;;  %v4045_v4 = vadd.f32 %v3969_v36, %v1841_v17  ;;  %v1953_v20 = vsel %vm521_vm0, %v4035_v29, -inf }
 0x423   : > { %v1962_v62 = vsel %vm521_vm0, %v4038_v16, -inf }
 0x424   : > { %v1956_v34 = vsel %vm521_vm0, %v4045_v4, -inf }
 0x425   : > { %1963 = vmax.xlane.f32.xlu0 %v1962_v62 }
 0x426   : > { %1954 = vmax.xlane.f32.xlu1 %v1953_v20  ;;  %v3120_v24 = vpop.f32.mrb[48].mxu1 }
 0x427   : > { %v4050_v25 = vadd.f32 %v3120_v24, %v3969_v36  ;;  %v1854_v26 = vpop.f32.mrb[49].mxu1 }
 0x428   : > { %v3121_v30 = vpop.f32.mrb[50].mxu1  ;;  %v4055_v27 = vadd.f32 %v3969_v36, %v1854_v26 }
 0x429   : > { %v4058_v28 = vadd.f32 %v3121_v30, %v3969_v36  ;;  %1957 = vmax.xlane.f32.xlu0 %v1956_v34  ;;  %v1857_v38 = vpop.f32.mrb[51].mxu1  ;;  %v1971_v37 = vsel %vm521_vm0, %v4050_v25, -inf }
 0x42a   : > { %1972 = vmax.xlane.f32.xlu1 %v1971_v37  ;;  %v4065_v40 = vadd.f32 %v3969_v36, %v1857_v38  ;;  %v1965_v42 = vsel %vm521_vm0, %v4055_v27, -inf }
 0x42b   : > { %v1974_v31 = vsel %vm521_vm0, %v4058_v28, -inf }
 0x42c   : > { %v1968_v51 = vsel %vm521_vm0, %v4065_v40, -inf }
 0x42d   : > { %1975 = vmax.xlane.f32.xlu0 %v1974_v31 }
 0x42e   : > { %1966 = vmax.xlane.f32.xlu1 %v1965_v42  ;;  %v3124_v44 = vpop.f32.mrb[52].mxu1 }
 0x42f   : > { %v4070_v23 = vadd.f32 %v3124_v44, %v3969_v36  ;;  %v1870_v47 = vpop.f32.mrb[53].mxu1 }
 0x430   : > { %v3125_v53 = vpop.f32.mrb[54].mxu1  ;;  %v4075_v54 = vadd.f32 %v3969_v36, %v1870_v47 }
 0x431   : > { %v4078_v58 = vadd.f32 %v3125_v53, %v3969_v36  ;;  %1969 = vmax.xlane.f32.xlu0 %v1968_v51  ;;  %v1873_v55 = vpop.f32.mrb[55].mxu1  ;;  %v1983_v63 = vsel %vm521_vm0, %v4070_v23, -inf  ;;  %v3209_v53 = vpack.i.bf16 %v3754_v21, %v3747_v13  ;;  %v4137_v51 = vpop.permute.xlu1 %3145 }
 0x432   : > { %1984 = vmax.xlane.f32.xlu1 %v1983_v63  ;;  %v4085_v43 = vadd.f32 %v3969_v36, %v1873_v55  ;;  %v1977_v49 = vsel %vm521_vm0, %v4075_v54, -inf  ;;  %v4141_v63 = vpop.permute.xlu0 %3150 }
 0x433   : > { %v1986_v12 = vsel %vm521_vm0, %v4078_v58, -inf }
 0x434   : > { %v1980_v5 = vsel %vm521_vm0, %v4085_v43, -inf }
 0x435   : > { %1987 = vmax.xlane.f32.xlu0 %v1986_v12  ;;  %v4139_v55 = vpop.permute.xlu1 %3155 }
 0x436   : > { %1978 = vmax.xlane.f32.xlu1 %v1977_v49  ;;  %v3128_v60 = vpop.f32.mrb[56].mxu1  ;;  %v4145_v49 = vpop.permute.xlu0 %3165 }
 0x437   : > { %v4090_v61 = vadd.f32 %v3128_v60, %v3969_v36  ;;  %v1886_v1 = vpop.f32.mrb[57].mxu1 }
 0x438   : > { %v3129_v3 = vpop.f32.mrb[58].mxu1  ;;  %v4095_v6 = vadd.f32 %v3969_v36, %v1886_v1 }
 0x439   : > { %v4098_v2 = vadd.f32 %v3129_v3, %v3969_v36  ;;  %1981 = vmax.xlane.f32.xlu0 %v1980_v5  ;;  %v1889_v22 = vpop.f32.mrb[59].mxu1  ;;  %v1995_v11 = vsel %vm521_vm0, %v4090_v61, -inf  ;;  %v4143_v12 = vpop.permute.xlu1 %3160 }
 0x43a   : > { %1996 = vmax.xlane.f32.xlu1 %v1995_v11  ;;  %v4105_v9 = vadd.f32 %v3969_v36, %v1889_v22  ;;  %v1989_v17 = vsel %vm521_vm0, %v4095_v6, -inf  ;;  %v4149_v13 = vpop.permute.xlu0 %3175 }
 0x43b   : > { %v1998_v14 = vsel %vm521_vm0, %v4098_v2, -inf }
 0x43c   : > { %v1992_v26 = vsel %vm521_vm0, %v4105_v9, -inf }
 0x43d   : > { %1999 = vmax.xlane.f32.xlu0 %v1998_v14  ;;  %v4147_v60 = vpop.permute.xlu1 %3170 }
 0x43e   : > { %1990 = vmax.xlane.f32.xlu1 %v1989_v17  ;;  %v3132_v35 = vpop.f32.mrb[60].mxu1  ;;  %v4153_v1 = vpop.permute.xlu0 %3185 }
 0x43f   : > { %v4110_v62 = vadd.f32 %v3132_v35, %v3969_v36  ;;  %v1902_v20 = vpop.f32.mrb[61].mxu1 }
 0x440   : > { %v3133_v24 = vpop.f32.mrb[62].mxu1  ;;  %v4115_v30 = vadd.f32 %v3969_v36, %v1902_v20 }
 0x441   : > { %v4118_v34 = vadd.f32 %v3133_v24, %v3969_v36  ;;  %1993 = vmax.xlane.f32.xlu0 %v1992_v26  ;;  %v1905_v38 = vpop.f32.mrb[63].mxu1  ;;  %v2007_v37 = vsel %vm521_vm0, %v4110_v62, -inf  ;;  %v4151_v21 = vpop.permute.xlu1 %3180 }
 0x442   : > { %v4123_v31 = vadd.f32 %v3969_v36, %v1905_v38  ;;  %2008 = vmax.xlane.f32.xlu1 %v2007_v37  ;;  %v2001_v44 = vsel %vm521_vm0, %v4115_v30, -inf  ;;  %v3204_v36 = vpack.i.bf16 %v3760_v33, %v3751_v19  ;;  %v4157_v33 = vpop.permute.xlu0 %3195 }
 0x443   : > { %v2010_v42 = vsel %vm521_vm0, %v4118_v34, -inf }
 0x444   : > { %v2004_v47 = vsel %vm521_vm0, %v4123_v31, -inf }
 0x445   : > { %2011 = vmax.xlane.f32.xlu0 %v2010_v42  ;;  %v4155_v19 = vpop.permute.xlu1 %3190 }
 0x446   : > { %2002 = vmax.xlane.f32.xlu1 %v2001_v44 }
 0x449   : > { %2005 = vmax.xlane.f32.xlu0 %v2004_v47  ;;  %v4159_v3 = vpop.permute.xlu1 %3200 }
 0x457   : > { %3210 = vrot.lane.b32.xlu1 %v3209_v53, %s3452_s20 }
 0x45f   : > { %3205 = vrot.lane.b32.xlu0 %v3204_v36, %s3452_s20 }
 0x496   : > { %v1925_v5 = vpop.xlane.xlu0 %1924 }
 0x497   : > { %v2015_v22 = vsub.f32 %v3972_v39, %v1925_v5 }
 0x499   : > { %v2049_v11 = vmul.f32 1.442695, %v2015_v22  ;;  %v1922_v14 = vpop.xlane.xlu1 %1921 }
 0x49a   : > { %v1919_v17 = vpop.xlane.xlu0 %1918  ;;  %v2014_v20 = vsub.f32 %v3980_v46, %v1922_v14 }
 0x49b   : > { %3315 = vpow2.f32 %v2049_v11  ;;  %v2013_v35 = vsub.f32 %v3975_v41, %v1919_v17 }
 0x49c   : > { %v2047_v44 = vmul.f32 1.442695, %v2014_v20 }
 0x49d   : > { %v2045_v24 = vmul.f32 1.442695, %v2013_v35 }
 0x49e   : > { %v1928_v26 = vpop.xlane.xlu0 %1927 }
 0x49f   : > { %3317 = vpow2.f32 %v2045_v24  ;;  %v2016_v38 = vsub.f32 %v3985_v32, %v1928_v26  ;;  %v1937_v37 = vpop.xlane.xlu1 %1936 }
 0x4a0   : > { %v2019_v42 = vsub.f32 %v3990_v48, %v1937_v37 }
 0x4a1   : > { %v2051_v47 = vmul.f32 1.442695, %v2016_v38 }
 0x4a2   : > { %v2057_v53 = vmul.f32 1.442695, %v2019_v42  ;;  %v1940_v39 = vpop.xlane.xlu0 %1939 }
 0x4a3   : > { %3319 = vpow2.f32 %v2051_v47  ;;  %v2020_v36 = vsub.f32 %v3998_v15, %v1940_v39  ;;  %v1931_v5 = vpop.xlane.xlu1 %1930 }
 0x4a4   : > { %3321 = vpow2.f32 %v2057_v53  ;;  %v2017_v41 = vsub.f32 %v3995_v59, %v1931_v5 }
 0x4a5   : > { %v4168_v46 = vpop.eup %3315  ;;  %3323 = vpow2.f32 %v2047_v44  ;;  %v2059_v22 = vmul.f32 1.442695, %v2020_v36 }
 0x4a6   : > { %v2053_v11 = vmul.f32 1.442695, %v2017_v41  ;;  %v1934_v32 = vpop.xlane.xlu0 %1933  ;;  %v2115_v48 = vsel %vm521_vm0, %v4168_v46, 0.0 }
 0x4a7   : > { %v2018_v14 = vsub.f32 %v4005_v18, %v1934_v32  ;;  %v1949_v17 = vpop.xlane.xlu1 %1948  ;;  %2116 = vadd.xlane.f32.xlu1 %v2115_v48 }
 0x4a8   : > { %3325 = vpow2.f32 %v2053_v11  ;;  %v2023_v15 = vsub.f32 %v4010_v10, %v1949_v17 }
 0x4a9   : > { %v4174_v35 = vpop.eup %3317  ;;  %3327 = vpow2.f32 %v2059_v22  ;;  %v2055_v59 = vmul.f32 1.442695, %v2018_v14 }
 0x4aa   : > { %v2065_v20 = vmul.f32 1.442695, %v2023_v15  ;;  %v1952_v24 = vpop.xlane.xlu0 %1951  ;;  %v2109_v26 = vsel %vm521_vm0, %v4174_v35, 0.0 }
 0x4ab   : > { %v2024_v38 = vsub.f32 %v4018_v57, %v1952_v24  ;;  %v1943_v37 = vpop.xlane.xlu1 %1942  ;;  %2110 = vadd.xlane.f32.xlu1 %v2109_v26 }
 0x4ac   : > { %3329 = vpow2.f32 %v2065_v20  ;;  %v2021_v18 = vsub.f32 %v4015_v50, %v1943_v37 }
 0x4ad   : > { %v4180_v42 = vpop.eup %3319  ;;  %3331 = vpow2.f32 %v2055_v59  ;;  %v2067_v10 = vmul.f32 1.442695, %v2024_v38 }
 0x4ae   : > { %v4182_v44 = vpop.eup %3321  ;;  %v2061_v47 = vmul.f32 1.442695, %v2021_v18  ;;  %v1946_v53 = vpop.xlane.xlu0 %1945  ;;  %v2118_v39 = vsel %vm521_vm0, %v4180_v42, 0.0 }
 0x4af   : > { %v4186_v36 = vpop.eup %3323  ;;  %v2022_v57 = vsub.f32 %v4025_v7, %v1946_v53  ;;  %v1961_v5 = vpop.xlane.xlu1 %1960  ;;  %2119 = vadd.xlane.f32.xlu0 %v2118_v39  ;;  %v2127_v50 = vsel %vm521_vm0, %v4182_v44, 0.0 }
 0x4b0   : > { %3333 = vpow2.f32 %v2061_v47  ;;  %v2027_v41 = vsub.f32 %v4030_v8, %v1961_v5  ;;  %2128 = vadd.xlane.f32.xlu1 %v2127_v50  ;;  %v2112_v14 = vsel %vm521_vm0, %v4186_v36, 0.0 }
 0x4b1   : > { %3335 = vpow2.f32 %v2067_v10  ;;  %v2063_v22 = vmul.f32 1.442695, %v2022_v57 }
 0x4b2   : > { %v4192_v11 = vpop.eup %3325  ;;  %v2073_v32 = vmul.f32 1.442695, %v2027_v41  ;;  %v1964_v48 = vpop.xlane.xlu0 %1963 }
 0x4b3   : > { %v4196_v17 = vpop.eup %3327  ;;  %v2028_v7 = vsub.f32 %v4038_v16, %v1964_v48  ;;  %v1955_v15 = vpop.xlane.xlu1 %1954  ;;  %2113 = vadd.xlane.f32.xlu0 %v2112_v14  ;;  %v2121_v59 = vsel %vm521_vm0, %v4192_v11, 0.0 }
 0x4b4   : > { %3337 = vpow2.f32 %v2073_v32  ;;  %v2025_v8 = vsub.f32 %v4035_v29, %v1955_v15  ;;  %2122 = vadd.xlane.f32.xlu1 %v2121_v59  ;;  %v2130_v37 = vsel %vm521_vm0, %v4196_v17, 0.0 }
 0x4b5   : > { %3339 = vpow2.f32 %v2063_v22  ;;  %v2075_v20 = vmul.f32 1.442695, %v2028_v7 }
 0x4b6   : > { %v4202_v24 = vpop.eup %3329  ;;  %v2069_v26 = vmul.f32 1.442695, %v2025_v8  ;;  %v1958_v38 = vpop.xlane.xlu0 %1957 }
 0x4b7   : > { %v4206_v18 = vpop.eup %3331  ;;  %v2026_v16 = vsub.f32 %v4045_v4, %v1958_v38  ;;  %v1973_v10 = vpop.xlane.xlu1 %1972  ;;  %2131 = vadd.xlane.f32.xlu0 %v2130_v37  ;;  %v2139_v47 = vsel %vm521_vm0, %v4202_v24, 0.0 }
 0x4b8   : > { %3341 = vpow2.f32 %v2069_v26  ;;  %v2031_v29 = vsub.f32 %v4050_v25, %v1973_v10  ;;  %2140 = vadd.xlane.f32.xlu1 %v2139_v47  ;;  %v2124_v50 = vsel %vm521_vm0, %v4206_v18, 0.0 }
 0x4b9   : > { %3343 = vpow2.f32 %v2075_v20  ;;  %v2071_v53 = vmul.f32 1.442695, %v2026_v16 }
 0x4ba   : > { %v4212_v39 = vpop.eup %3333  ;;  %v2081_v57 = vmul.f32 1.442695, %v2031_v29  ;;  %v1976_v5 = vpop.xlane.xlu0 %1975 }
 0x4bb   : > { %v4216_v41 = vpop.eup %3335  ;;  %v2032_v4 = vsub.f32 %v4058_v28, %v1976_v5  ;;  %v1967_v22 = vpop.xlane.xlu1 %1966  ;;  %2125 = vadd.xlane.f32.xlu0 %v2124_v50  ;;  %v2133_v32 = vsel %vm521_vm0, %v4212_v39, 0.0 }
 0x4bc   : > { %3345 = vpow2.f32 %v2081_v57  ;;  %v2029_v25 = vsub.f32 %v4055_v27, %v1967_v22  ;;  %2134 = vadd.xlane.f32.xlu1 %v2133_v32  ;;  %v2142_v59 = vsel %vm521_vm0, %v4216_v41, 0.0 }
 0x4bd   : > { %3347 = vpow2.f32 %v2071_v53  ;;  %v2083_v48 = vmul.f32 1.442695, %v2032_v4 }
 0x4be   : > { %v4222_v14 = vpop.eup %3337  ;;  %v2077_v7 = vmul.f32 1.442695, %v2029_v25  ;;  %v1970_v15 = vpop.xlane.xlu0 %1969 }
 0x4bf   : > { %v4226_v8 = vpop.eup %3339  ;;  %v2030_v28 = vsub.f32 %v4065_v40, %v1970_v15  ;;  %v1985_v20 = vpop.xlane.xlu1 %1984  ;;  %2143 = vadd.xlane.f32.xlu0 %v2142_v59  ;;  %v2151_v26 = vsel %vm521_vm0, %v4222_v14, 0.0 }
 0x4c0   : > { %3349 = vpow2.f32 %v2077_v7  ;;  %v2035_v27 = vsub.f32 %v4070_v23, %v1985_v20  ;;  %2152 = vadd.xlane.f32.xlu1 %v2151_v26  ;;  %v2136_v47 = vsel %vm521_vm0, %v4226_v8, 0.0 }
 0x4c1   : > { %3351 = vpow2.f32 %v2083_v48  ;;  %v2079_v38 = vmul.f32 1.442695, %v2030_v28 }
 0x4c2   : > { %v4232_v37 = vpop.eup %3341  ;;  %v2089_v16 = vmul.f32 1.442695, %v2035_v27  ;;  %v1988_v10 = vpop.xlane.xlu0 %1987 }
 0x4c3   : > { %v4236_v29 = vpop.eup %3343  ;;  %v2036_v40 = vsub.f32 %v4078_v58, %v1988_v10  ;;  %v1979_v53 = vpop.xlane.xlu1 %1978  ;;  %2137 = vadd.xlane.f32.xlu0 %v2136_v47  ;;  %v2145_v57 = vsel %vm521_vm0, %v4232_v37, 0.0 }
 0x4c4   : > { %3353 = vpow2.f32 %v2089_v16  ;;  %v2033_v23 = vsub.f32 %v4075_v54, %v1979_v53  ;;  %2146 = vadd.xlane.f32.xlu1 %v2145_v57  ;;  %v2154_v32 = vsel %vm521_vm0, %v4236_v29, 0.0 }
 0x4c5   : > { %3355 = vpow2.f32 %v2079_v38  ;;  %v2091_v5 = vmul.f32 1.442695, %v2036_v40 }
 0x4c6   : > { %v4242_v50 = vpop.eup %3345  ;;  %v2085_v4 = vmul.f32 1.442695, %v2033_v23  ;;  %v1982_v22 = vpop.xlane.xlu0 %1981 }
 0x4c7   : > { %v4246_v25 = vpop.eup %3347  ;;  %v2034_v58 = vsub.f32 %v4085_v43, %v1982_v22  ;;  %v1997_v48 = vpop.xlane.xlu1 %1996  ;;  %2155 = vadd.xlane.f32.xlu0 %v2154_v32  ;;  %v2163_v7 = vsel %vm521_vm0, %v4242_v50, 0.0 }
 0x4c8   : > { %3357 = vpow2.f32 %v2085_v4  ;;  %v2039_v54 = vsub.f32 %v4090_v61, %v1997_v48  ;;  %2164 = vadd.xlane.f32.xlu1 %v2163_v7  ;;  %v2148_v26 = vsel %vm521_vm0, %v4246_v25, 0.0 }
 0x4c9   : > { %3359 = vpow2.f32 %v2091_v5  ;;  %v2087_v15 = vmul.f32 1.442695, %v2034_v58 }
 0x4ca   : > { %v4252_v59 = vpop.eup %3349  ;;  %v2097_v28 = vmul.f32 1.442695, %v2039_v54  ;;  %v2000_v20 = vpop.xlane.xlu0 %1999 }
 0x4cb   : > { %v4256_v27 = vpop.eup %3351  ;;  %v2040_v43 = vsub.f32 %v4098_v2, %v2000_v20  ;;  %v1991_v38 = vpop.xlane.xlu1 %1990  ;;  %2149 = vadd.xlane.f32.xlu0 %v2148_v26  ;;  %v2157_v16 = vsel %vm521_vm0, %v4252_v59, 0.0 }
 0x4cc   : > { %3361 = vpow2.f32 %v2097_v28  ;;  %v2037_v61 = vsub.f32 %v4095_v6, %v1991_v38  ;;  %2158 = vadd.xlane.f32.xlu1 %v2157_v16  ;;  %v2166_v57 = vsel %vm521_vm0, %v4256_v27, 0.0 }
 0x4cd   : > { %3363 = vpow2.f32 %v2087_v15  ;;  %v2099_v10 = vmul.f32 1.442695, %v2040_v43 }
 0x4ce   : > { %v4262_v47 = vpop.eup %3353  ;;  %v2093_v40 = vmul.f32 1.442695, %v2037_v61  ;;  %v1994_v53 = vpop.xlane.xlu0 %1993 }
 0x4cf   : > { %v4266_v23 = vpop.eup %3355  ;;  %v2038_v2 = vsub.f32 %v4105_v9, %v1994_v53  ;;  %v2009_v5 = vpop.xlane.xlu1 %2008  ;;  %2167 = vadd.xlane.f32.xlu0 %v2166_v57  ;;  %v2175_v4 = vsel %vm521_vm0, %v4262_v47, 0.0 }
 0x4d0   : > { %3365 = vpow2.f32 %v2093_v40  ;;  %v2043_v6 = vsub.f32 %v4110_v62, %v2009_v5  ;;  %2176 = vadd.xlane.f32.xlu1 %v2175_v4  ;;  %v2160_v7 = vsel %vm521_vm0, %v4266_v23, 0.0 }
 0x4d1   : > { %3367 = vpow2.f32 %v2099_v10  ;;  %v2095_v22 = vmul.f32 1.442695, %v2038_v2 }
 0x4d2   : > { %v4272_v32 = vpop.eup %3357  ;;  %v2105_v58 = vmul.f32 1.442695, %v2043_v6  ;;  %v2012_v48 = vpop.xlane.xlu0 %2011 }
 0x4d3   : > { %v4276_v54 = vpop.eup %3359  ;;  %v2044_v9 = vsub.f32 %v4118_v34, %v2012_v48  ;;  %v2003_v15 = vpop.xlane.xlu1 %2002  ;;  %2161 = vadd.xlane.f32.xlu0 %v2160_v7  ;;  %v2169_v28 = vsel %vm521_vm0, %v4272_v32, 0.0 }
 0x4d4   : > { %3369 = vpow2.f32 %v2105_v58  ;;  %v2041_v62 = vsub.f32 %v4115_v30, %v2003_v15  ;;  %2170 = vadd.xlane.f32.xlu1 %v2169_v28  ;;  %v2178_v16 = vsel %vm521_vm0, %v4276_v54, 0.0 }
 0x4d5   : > { %3371 = vpow2.f32 %v2095_v22  ;;  %v2107_v20 = vmul.f32 1.442695, %v2044_v9 }
 0x4d6   : > { %v4282_v26 = vpop.eup %3361  ;;  %v2101_v43 = vmul.f32 1.442695, %v2041_v62  ;;  %v2006_v38 = vpop.xlane.xlu0 %2005  ;;  %v3219_v62 = vpack.i.bf16 %v3774_v56, %v3767_v45  ;;  %v3152_v56 = vunpack.i.l.bf16 %v4141_v63 }
 0x4d7   : > { %v4286_v61 = vpop.eup %3363  ;;  %v2042_v34 = vsub.f32 %v4123_v31, %v2006_v38  ;;  %2179 = vadd.xlane.f32.xlu0 %v2178_v16  ;;  %v2187_v10 = vsel %vm521_vm0, %v4282_v26, 0.0 }
 0x4d8   : > { %3373 = vpow2.f32 %v2101_v43  ;;  %2188 = vadd.xlane.f32.xlu1 %v2187_v10  ;;  %v2172_v53 = vsel %vm521_vm0, %v4286_v61, 0.0  ;;  %v4327_v43 = vpop.permute.xlu1 %3210 }
 0x4d9   : > { %3375 = vpow2.f32 %v2107_v20  ;;  %v2103_v30 = vmul.f32 1.442695, %v2042_v34  ;;  %v3214_v20 = vpack.i.bf16 %v3780_v0, %v3771_v52 }
 0x4da   : > { %v4291_v40 = vpop.eup %3365  ;;  %v4329_v16 = vpop.permute.xlu0 %3205 }
 0x4db   : > { %v4295_v57 = vpop.eup %3367  ;;  %2173 = vadd.xlane.f32.xlu0 %v2172_v53  ;;  %v2181_v2 = vsel %vm521_vm0, %v4291_v40, 0.0  ;;  %3377 = vpow2.f32 %v2103_v30 }
 0x4dc   : > { %2182 = vadd.xlane.f32.xlu1 %v2181_v2  ;;  %v2190_v5 = vsel %vm521_vm0, %v4295_v57, 0.0 }
 0x4de   : > { %v4299_v31 = vpop.eup %3369 }
 0x4df   : > { %v4303_v4 = vpop.eup %3371  ;;  %2191 = vadd.xlane.f32.xlu0 %v2190_v5  ;;  %v2199_v6 = vsel %vm521_vm0, %v4299_v31, 0.0 }
 0x4e0   : > { %2200 = vadd.xlane.f32.xlu1 %v2199_v6  ;;  %v2184_v58 = vsel %vm521_vm0, %v4303_v4, 0.0 }
 0x4e2   : > { %v4307_v22 = vpop.eup %3373 }
 0x4e3   : > { %v4311_v48 = vpop.eup %3375  ;;  %2185 = vadd.xlane.f32.xlu0 %v2184_v58  ;;  %v2193_v7 = vsel %vm521_vm0, %v4307_v22, 0.0  ;;  %v3147_v58 = vunpack.i.l.bf16 %v4137_v51 }
 0x4e4   : > { %2194 = vadd.xlane.f32.xlu1 %v2193_v7  ;;  %v2202_v9 = vsel %vm521_vm0, %v4311_v48, 0.0 }
 0x4e5   : > { %v4317_v15 = vpop.eup %3377 }
 0x4e6   : > { %v2196_v28 = vsel %vm521_vm0, %v4317_v15, 0.0 }
 0x4e7   : > { %2203 = vadd.xlane.f32.xlu0 %v2202_v9 }
 0x4eb   : > { %2197 = vadd.xlane.f32.xlu0 %v2196_v28 }
 0x4f5   : > { %3220 = vrot.lane.b32.xlu1 %v3219_v62, %s3452_s20 }
 0x501   : > { %3215 = vrot.lane.b32.xlu0 %v3214_v20, %s3452_s20  ;;  %s4337_s20 = scalar_lea.vmem %s4506_s10, %s3528_s24 }
 0x534   : > { %v2117_v38 = vpop.xlane.xlu1 %2116 }
 0x535   : > { %3379 = vrcp.f32 %v2117_v38 }
 0x538   : > { %v2111_v34 = vpop.xlane.xlu1 %2110 }
 0x539   : > { %3381 = vrcp.f32 %v2111_v34  ;;  %v3153_v34 = vunpack.i.h.bf16 %v4141_v63 }
 0x53c   : > { %v2120_v10 = vpop.xlane.xlu0 %2119 }
 0x53d   : > { %3383 = vrcp.f32 %v2120_v10  ;;  %v2129_v30 = vpop.xlane.xlu1 %2128 }
 0x53e   : > { %3385 = vrcp.f32 %v2129_v30 }
 0x53f   : > { %v3380_v45 = vpop.eup %3379 }
 0x540   : > { %v2210_v52 = vmul.f32 %v3380_v45, %v4168_v46  ;;  %v2114_v0 = vpop.xlane.xlu0 %2113  ;;  %v3162_v45 = vunpack.i.l.bf16 %v4143_v12 }
 0x541   : > { %3387 = vrcp.f32 %v2114_v0  ;;  %v2123_v53 = vpop.xlane.xlu1 %2122 }
 0x542   : > { %v2399_v2 = vsel %vm521_vm0, %v2210_v52, %v3152_v56  ;;  %3389 = vrcp.f32 %v2123_v53 }
 0x543   : > { %v3382_v5 = vpop.eup %3381  ;;  %v2800_v6 = vpack.c.bf16 %v2399_v2, %v2399_v2 }
 0x544   : > { %v2206_v46 = vmul.f32 %v3382_v5, %v4174_v35  ;;  %v2132_v7 = vpop.xlane.xlu0 %2131 }
 0x545   : > { %2560 = vst.msk [vmem:[%s4337_s20 + $0x8] sm:$0xf] %vm2557_vm3, %v2800_v6  ;;  %3391 = vrcp.f32 %v2132_v7  ;;  %v2141_v9 = vpop.xlane.xlu1 %2140 }
 0x546   : > { %v2397_v28 = vsel %vm521_vm0, %v2206_v46, %v3147_v58  ;;  %3393 = vrcp.f32 %v2141_v9  ;;  %v3157_v46 = vunpack.i.l.bf16 %v4139_v55 }
 0x547   : > { %v3384_v62 = vpop.eup %3383  ;;  %v2798_v20 = vpack.c.bf16 %v2397_v28, %v2397_v28 }
 0x548   : > { %v3386_v38 = vpop.eup %3385  ;;  %v2212_v10 = vmul.f32 %v3384_v62, %v4180_v42  ;;  %v2126_v30 = vpop.xlane.xlu0 %2125  ;;  %v3148_v42 = vunpack.i.h.bf16 %v4137_v51 }
 0x549   : > { %2558 = vst.msk [vmem:[%s4337_s20] sm:$0xf] %vm2557_vm3, %v2798_v20  ;;  %v2218_v35 = vmul.f32 %v3386_v38, %v4182_v44  ;;  %3395 = vrcp.f32 %v2126_v30  ;;  %v2135_v56 = vpop.xlane.xlu1 %2134  ;;  %v3163_v20 = vunpack.i.h.bf16 %v4143_v12 }
 0x54a   : > { %v2400_v52 = vsel %vm521_vm0, %v2212_v10, %v3153_v34  ;;  %3397 = vrcp.f32 %v2135_v56 }
 0x54b   : > { %v3388_v0 = vpop.eup %3387  ;;  %v2801_v53 = vpack.c.bf16 %v2400_v52, %v2400_v52  ;;  %v2403_v63 = vsel %vm521_vm0, %v2218_v35, %v3162_v45 }
 0x54c   : > { %v3390_v2 = vpop.eup %3389  ;;  %v2804_v5 = vpack.c.bf16 %v2403_v63, %v2403_v63  ;;  %v2208_v6 = vmul.f32 %v3388_v0, %v4186_v36  ;;  %v2144_v58 = vpop.xlane.xlu0 %2143  ;;  %v3158_v0 = vunpack.i.h.bf16 %v4139_v55 }
 0x54d   : > { %2561 = vst.msk [vmem:[%s4337_s20 + $0xc] sm:$0xf] %vm2557_vm3, %v2801_v53  ;;  %v2214_v44 = vmul.f32 %v3390_v2, %v4192_v11  ;;  %3399 = vrcp.f32 %v2144_v58  ;;  %v2153_v7 = vpop.xlane.xlu1 %2152  ;;  %v3172_v11 = vunpack.i.l.bf16 %v4147_v60 }
 0x54e   : > { %2564 = vst.msk [vmem:[%s4337_s20 + $0x18] sm:$0xf] %vm2557_vm3, %v2804_v5  ;;  %v2398_v9 = vsel %vm521_vm0, %v2208_v6, %v3148_v42  ;;  %3401 = vrcp.f32 %v2153_v7 }
 0x54f   : > { %v3392_v51 = vpop.eup %3391  ;;  %v2799_v28 = vpack.c.bf16 %v2398_v9, %v2398_v9  ;;  %v2401_v36 = vsel %vm521_vm0, %v2214_v44, %v3157_v46  ;;  %v3173_v44 = vunpack.i.h.bf16 %v4147_v60 }
 0x550   : > { %v3394_v62 = vpop.eup %3393  ;;  %v2802_v38 = vpack.c.bf16 %v2401_v36, %v2401_v36  ;;  %v2220_v34 = vmul.f32 %v3392_v51, %v4196_v17  ;;  %v2138_v10 = vpop.xlane.xlu0 %2137 }
 0x551   : > { %2559 = vst.msk [vmem:[%s4337_s20 + $0x4] sm:$0xf] %vm2557_vm3, %v2799_v28  ;;  %v2226_v30 = vmul.f32 %v3394_v62, %v4202_v24  ;;  %3403 = vrcp.f32 %v2138_v10  ;;  %v2147_v45 = vpop.xlane.xlu1 %2146  ;;  %v3167_v24 = vunpack.i.l.bf16 %v4145_v49 }
 0x552   : > { %2562 = vst.msk [vmem:[%s4337_s20 + $0x10] sm:$0xf] %vm2557_vm3, %v2802_v38  ;;  %v2404_v35 = vsel %vm521_vm0, %v2220_v34, %v3163_v20  ;;  %3405 = vrcp.f32 %v2147_v45  ;;  %v3168_v34 = vunpack.i.h.bf16 %v4145_v49 }
 0x553   : > { %v3396_v12 = vpop.eup %3395  ;;  %v2805_v56 = vpack.c.bf16 %v2404_v35, %v2404_v35  ;;  %v2407_v17 = vsel %vm521_vm0, %v2226_v30, %v3172_v11 }
 0x554   : > { %v3398_v52 = vpop.eup %3397  ;;  %v2808_v53 = vpack.c.bf16 %v2407_v17, %v2407_v17  ;;  %v2216_v63 = vmul.f32 %v3396_v12, %v4206_v18  ;;  %v2156_v2 = vpop.xlane.xlu0 %2155 }
 0x555   : > { %2565 = vst.msk [vmem:[%s4337_s20 + $0x1c] sm:$0xf] %vm2557_vm3, %v2805_v56  ;;  %v2222_v42 = vmul.f32 %v3398_v52, %v4212_v39  ;;  %3407 = vrcp.f32 %v2156_v2  ;;  %v2165_v5 = vpop.xlane.xlu1 %2164  ;;  %v3182_v39 = vunpack.i.l.bf16 %v4151_v21  ;;  %v3183_v52 = vunpack.i.h.bf16 %v4151_v21 }
 0x556   : > { %2568 = vst.msk [vmem:[%s4337_s20 + $0x28] sm:$0xf] %vm2557_vm3, %v2808_v53  ;;  %v2402_v6 = vsel %vm521_vm0, %v2216_v63, %v3158_v0  ;;  %3409 = vrcp.f32 %v2165_v5 }
 0x557   : > { %v3400_v55 = vpop.eup %3399  ;;  %v2803_v58 = vpack.c.bf16 %v2402_v6, %v2402_v6  ;;  %v2405_v18 = vsel %vm521_vm0, %v2222_v42, %v3167_v24 }
 0x558   : > { %v3402_v46 = vpop.eup %3401  ;;  %v2806_v7 = vpack.c.bf16 %v2405_v18, %v2405_v18  ;;  %v2228_v9 = vmul.f32 %v3400_v55, %v4216_v41  ;;  %v2150_v51 = vpop.xlane.xlu0 %2149  ;;  %v3178_v55 = vunpack.i.h.bf16 %v4149_v13 }
 0x559   : > { %2563 = vst.msk [vmem:[%s4337_s20 + $0x14] sm:$0xf] %vm2557_vm3, %v2803_v58  ;;  %v2234_v28 = vmul.f32 %v3402_v46, %v4222_v14  ;;  %3411 = vrcp.f32 %v2150_v51  ;;  %v2159_v36 = vpop.xlane.xlu1 %2158  ;;  %v3177_v14 = vunpack.i.l.bf16 %v4149_v13 }
 0x55a   : > { %2566 = vst.msk [vmem:[%s4337_s20 + $0x20] sm:$0xf] %vm2557_vm3, %v2806_v7  ;;  %v2408_v62 = vsel %vm521_vm0, %v2228_v9, %v3173_v44  ;;  %3413 = vrcp.f32 %v2159_v36 }
 0x55b   : > { %v3404_v60 = vpop.eup %3403  ;;  %v2809_v20 = vpack.c.bf16 %v2408_v62, %v2408_v62  ;;  %v2411_v41 = vsel %vm521_vm0, %v2234_v28, %v3182_v39  ;;  %v3193_v28 = vunpack.i.h.bf16 %v4155_v19 }
 0x55c   : > { %v3406_v38 = vpop.eup %3405  ;;  %v2812_v10 = vpack.c.bf16 %v2411_v41, %v2411_v41  ;;  %v2224_v11 = vmul.f32 %v3404_v60, %v4226_v8  ;;  %v2168_v30 = vpop.xlane.xlu0 %2167 }
 0x55d   : > { %2569 = vst.msk [vmem:[%s4337_s20 + $0x2c] sm:$0xf] %vm2557_vm3, %v2809_v20  ;;  %v2230_v45 = vmul.f32 %v3406_v38, %v4232_v37  ;;  %3415 = vrcp.f32 %v2168_v30  ;;  %v2177_v35 = vpop.xlane.xlu1 %2176  ;;  %v3192_v37 = vunpack.i.l.bf16 %v4155_v19 }
 0x55e   : > { %2572 = vst.msk [vmem:[%s4337_s20 + $0x38] sm:$0xf] %vm2557_vm3, %v2812_v10  ;;  %v2406_v12 = vsel %vm521_vm0, %v2224_v11, %v3168_v34  ;;  %3417 = vrcp.f32 %v2177_v35  ;;  %v3188_v11 = vunpack.i.h.bf16 %v4153_v1 }
 0x55f   : > { %v3408_v49 = vpop.eup %3407  ;;  %v2807_v56 = vpack.c.bf16 %v2406_v12, %v2406_v12  ;;  %v2409_v8 = vsel %vm521_vm0, %v2230_v45, %v3177_v14 }
 0x560   : > { %v3410_v17 = vpop.eup %3409  ;;  %v2810_v0 = vpack.c.bf16 %v2409_v8, %v2409_v8  ;;  %v2236_v53 = vmul.f32 %v3408_v49, %v4236_v29  ;;  %v2162_v63 = vpop.xlane.xlu0 %2161 }
 0x561   : > { %2567 = vst.msk [vmem:[%s4337_s20 + $0x24] sm:$0xf] %vm2557_vm3, %v2807_v56  ;;  %v2242_v2 = vmul.f32 %v3410_v17, %v4242_v50  ;;  %3419 = vrcp.f32 %v2162_v63  ;;  %v2171_v24 = vpop.xlane.xlu1 %2170  ;;  %v3187_v50 = vunpack.i.l.bf16 %v4153_v1  ;;  %v3203_v17 = vunpack.i.h.bf16 %v4159_v3 }
 0x562   : > { %2570 = vst.msk [vmem:[%s4337_s20 + $0x30] sm:$0xf] %vm2557_vm3, %v2810_v0  ;;  %v2412_v42 = vsel %vm521_vm0, %v2236_v53, %v3183_v52  ;;  %3421 = vrcp.f32 %v2171_v24 }
 0x563   : > { %v3412_v21 = vpop.eup %3411  ;;  %v2813_v5 = vpack.c.bf16 %v2412_v42, %v2412_v42  ;;  %v2415_v29 = vsel %vm521_vm0, %v2242_v2, %v3192_v37 }
 0x564   : > { %v3414_v6 = vpop.eup %3413  ;;  %v2816_v58 = vpack.c.bf16 %v2415_v29, %v2415_v29  ;;  %v2232_v18 = vmul.f32 %v3412_v21, %v4246_v25  ;;  %v2180_v46 = vpop.xlane.xlu0 %2179  ;;  %v3198_v21 = vunpack.i.h.bf16 %v4157_v33 }
 0x565   : > { %2573 = vst.msk [vmem:[%s4337_s20 + $0x3c] sm:$0xf] %vm2557_vm3, %v2813_v5  ;;  %v2238_v44 = vmul.f32 %v3414_v6, %v4252_v59  ;;  %3423 = vrcp.f32 %v2180_v46  ;;  %v2189_v7 = vpop.xlane.xlu1 %2188  ;;  %v3202_v59 = vunpack.i.l.bf16 %v4159_v3 }
 0x566   : > { %2576 = vst.msk [vmem:[%s4337_s20 + $0x48] sm:$0xf] %vm2557_vm3, %v2816_v58  ;;  %v2410_v9 = vsel %vm521_vm0, %v2232_v18, %v3178_v55  ;;  %3425 = vrcp.f32 %v2189_v7 }
 0x567   : > { %v3416_v13 = vpop.eup %3415  ;;  %v2811_v51 = vpack.c.bf16 %v2410_v9, %v2410_v9  ;;  %v2413_v25 = vsel %vm521_vm0, %v2238_v44, %v3187_v50  ;;  %v3213_v44 = vunpack.i.h.bf16 %v4327_v43 }
 0x568   : > { %v3418_v39 = vpop.eup %3417  ;;  %v2814_v36 = vpack.c.bf16 %v2413_v25, %v2413_v25  ;;  %v2244_v62 = vmul.f32 %v3416_v13, %v4256_v27  ;;  %v2174_v60 = vpop.xlane.xlu0 %2173 }
 0x569   : > { %2571 = vst.msk [vmem:[%s4337_s20 + $0x34] sm:$0xf] %vm2557_vm3, %v2811_v51  ;;  %v2250_v20 = vmul.f32 %v3418_v39, %v4262_v47  ;;  %3427 = vrcp.f32 %v2174_v60  ;;  %v2183_v41 = vpop.xlane.xlu1 %2182  ;;  %v3197_v47 = vunpack.i.l.bf16 %v4157_v33 }
 0x56a   : > { %2574 = vst.msk [vmem:[%s4337_s20 + $0x40] sm:$0xf] %vm2557_vm3, %v2814_v36  ;;  %v2416_v38 = vsel %vm521_vm0, %v2244_v62, %v3193_v28  ;;  %3429 = vrcp.f32 %v2183_v41 }
 0x56b   : > { %v3420_v19 = vpop.eup %3419  ;;  %v2817_v34 = vpack.c.bf16 %v2416_v38, %v2416_v38  ;;  %v2419_v27 = vsel %vm521_vm0, %v2250_v20, %v3202_v59 }
 0x56c   : > { %v3422_v10 = vpop.eup %3421  ;;  %v2820_v30 = vpack.c.bf16 %v2419_v27, %v2419_v27  ;;  %v2240_v14 = vmul.f32 %v3420_v19, %v4266_v23  ;;  %v2192_v45 = vpop.xlane.xlu0 %2191 }
 0x56d   : > { %2577 = vst.msk [vmem:[%s4337_s20 + $0x4c] sm:$0xf] %vm2557_vm3, %v2817_v34  ;;  %v2246_v35 = vmul.f32 %v3422_v10, %v4272_v32  ;;  %3431 = vrcp.f32 %v2192_v45  ;;  %v2201_v12 = vpop.xlane.xlu1 %2200  ;;  %v3212_v32 = vunpack.i.l.bf16 %v4327_v43 }
 0x56e   : > { %2580 = vst.msk [vmem:[%s4337_s20 + $0x58] sm:$0xf] %vm2557_vm3, %v2820_v30  ;;  %v2414_v49 = vsel %vm521_vm0, %v2240_v14, %v3188_v11  ;;  %3433 = vrcp.f32 %v2201_v12 }
 0x56f   : > { %v3424_v1 = vpop.eup %3423  ;;  %v2815_v56 = vpack.c.bf16 %v2414_v49, %v2414_v49  ;;  %v2417_v23 = vsel %vm521_vm0, %v2246_v35, %v3197_v47 }
 0x570   : > { %v3426_v8 = vpop.eup %3425  ;;  %v2818_v52 = vpack.c.bf16 %v2417_v23, %v2417_v23  ;;  %v2252_v0 = vmul.f32 %v3424_v1, %v4276_v54  ;;  %v2186_v53 = vpop.xlane.xlu0 %2185 }
 0x571   : > { %2575 = vst.msk [vmem:[%s4337_s20 + $0x44] sm:$0xf] %vm2557_vm3, %v2815_v56  ;;  %v2258_v63 = vmul.f32 %v3426_v8, %v4282_v26  ;;  %3435 = vrcp.f32 %v2186_v53  ;;  %v2195_v37 = vpop.xlane.xlu1 %2194  ;;  %v3207_v26 = vunpack.i.l.bf16 %v4329_v16 }
 0x572   : > { %2578 = vst.msk [vmem:[%s4337_s20 + $0x50] sm:$0xf] %vm2557_vm3, %v2818_v52  ;;  %v2420_v2 = vsel %vm521_vm0, %v2252_v0, %v3203_v17  ;;  %3437 = vrcp.f32 %v2195_v37 }
 0x573   : > { %v3428_v3 = vpop.eup %3427  ;;  %v2821_v24 = vpack.c.bf16 %v2420_v2, %v2420_v2  ;;  %v2423_v54 = vsel %vm521_vm0, %v2258_v63, %v3212_v32 }
 0x574   : > { %v3430_v42 = vpop.eup %3429  ;;  %v2824_v5 = vpack.c.bf16 %v2423_v54, %v2423_v54  ;;  %v2248_v29 = vmul.f32 %v3428_v3, %v4286_v61  ;;  %v2204_v6 = vpop.xlane.xlu0 %2203 }
 0x575   : > { %2581 = vst.msk [vmem:[%s4337_s20 + $0x5c] sm:$0xf] %vm2557_vm3, %v2821_v24  ;;  %v2254_v55 = vmul.f32 %v3430_v42, %v4291_v40  ;;  %3439 = vrcp.f32 %v2204_v6  ;;  %v3221_v18 = vpop.permute.xlu1 %3220 }
 0x576   : > { %2584 = vst.msk [vmem:[%s4337_s20 + $0x68] sm:$0xf] %vm2557_vm3, %v2824_v5  ;;  %v2418_v58 = vsel %vm521_vm0, %v2248_v29, %v3198_v21  ;;  %v3222_v51 = vunpack.i.l.bf16 %v3221_v18  ;;  %v3223_v34 = vunpack.i.h.bf16 %v3221_v18 }
 0x577   : > { %v3432_v46 = vpop.eup %3431  ;;  %v2819_v33 = vpack.c.bf16 %v2418_v58, %v2418_v58  ;;  %v2421_v50 = vsel %vm521_vm0, %v2254_v55, %v3207_v26 }
 0x578   : > { %v3434_v61 = vpop.eup %3433  ;;  %v2822_v7 = vpack.c.bf16 %v2421_v50, %v2421_v50  ;;  %v2260_v9 = vmul.f32 %v3432_v46, %v4295_v57  ;;  %v2198_v13 = vpop.xlane.xlu0 %2197  ;;  %v3208_v57 = vunpack.i.h.bf16 %v4329_v16 }
 0x579   : > { %2579 = vst.msk [vmem:[%s4337_s20 + $0x54] sm:$0xf] %vm2557_vm3, %v2819_v33  ;;  %v2266_v40 = vmul.f32 %v3434_v61, %v4299_v31  ;;  %3441 = vrcp.f32 %v2198_v13 }
 0x57a   : > { %2582 = vst.msk [vmem:[%s4337_s20 + $0x60] sm:$0xf] %vm2557_vm3, %v2822_v7  ;;  %v2424_v25 = vsel %vm521_vm0, %v2260_v9, %v3213_v44 }
 0x57b   : > { %v3436_v39 = vpop.eup %3435  ;;  %v2825_v28 = vpack.c.bf16 %v2424_v25, %v2424_v25  ;;  %v2427_v43 = vsel %vm521_vm0, %v2266_v40, %v3222_v51 }
 0x57c   : > { %v3438_v36 = vpop.eup %3437  ;;  %v2256_v62 = vmul.f32 %v3436_v39, %v4303_v4  ;;  %v2828_v60 = vpack.c.bf16 %v2427_v43, %v2427_v43  ;;  %v3216_v31 = vpop.permute.xlu0 %3215 }
 0x57d   : > { %2585 = vst.msk [vmem:[%s4337_s20 + $0x6c] sm:$0xf] %vm2557_vm3, %v2825_v28  ;;  %v2262_v59 = vmul.f32 %v3438_v36, %v4307_v22  ;;  %v3217_v20 = vunpack.i.l.bf16 %v3216_v31  ;;  %v3218_v14 = vunpack.i.h.bf16 %v3216_v31 }
 0x57e   : > { %v2422_v41 = vsel %vm521_vm0, %v2256_v62, %v3208_v57  ;;  %2588 = vst.msk [vmem:[%s4337_s20 + $0x78] sm:$0xf] %vm2557_vm3, %v2828_v60 }
 0x57f   : > { %v3440_v38 = vpop.eup %3439  ;;  %v2823_v19 = vpack.c.bf16 %v2422_v41, %v2422_v41  ;;  %v2425_v16 = vsel %vm521_vm0, %v2262_v59, %v3217_v20 }
 0x580   : > { %v2268_v4 = vmul.f32 %v3440_v38, %v4311_v48  ;;  %v2826_v27 = vpack.c.bf16 %v2425_v16, %v2425_v16 }
 0x581   : > { %2583 = vst.msk [vmem:[%s4337_s20 + $0x64] sm:$0xf] %vm2557_vm3, %v2823_v19 }
 0x582   : > { %v2428_v10 = vsel %vm521_vm0, %v2268_v4, %v3223_v34  ;;  %2586 = vst.msk [vmem:[%s4337_s20 + $0x70] sm:$0xf] %vm2557_vm3, %v2826_v27 }
 0x583   : > { %v3442_v22 = vpop.eup %3441  ;;  %v2829_v11 = vpack.c.bf16 %v2428_v10, %v2428_v10 }
 0x584   : > { %v2264_v30 = vmul.f32 %v3442_v22, %v4317_v15 }
 0x585   : > { %2589 = vst.msk [vmem:[%s4337_s20 + $0x7c] sm:$0xf] %vm2557_vm3, %v2829_v11 }
 0x586   : > { %v2426_v45 = vsel %vm521_vm0, %v2264_v30, %v3218_v14 }
 0x587   : > { %v2827_v47 = vpack.c.bf16 %v2426_v45, %v2426_v45 }
 0x589   : > { %2587 = vst.msk [vmem:[%s4337_s20 + $0x74] sm:$0xf] %vm2557_vm3, %v2827_v47 }
 0x58a PF: > { %s20_s13 = sadd.s32 1, %s3449_s13  }
 0x58b   : > { %p17_p4 = scmp.ge.s32.totalorder %s20_s13, 4  }
 0x58d   :  { %19 = sbr.rel (!%p17_p4) target bundleno = 1 (0x1), region = 93 }

</bundles_post_ra>
